<compile_context>
chip_gen: v5e
topology: v5e:2x2
jax: 0.10.0
libtpu: 0.0.40
codegen_flags: <defaults>
</compile_context>

<pallas_src>
import functools
import math

import numpy as np
import jax
import jax.numpy as jnp
from jax.experimental import pallas as pl
from jax.experimental.pallas import tpu as pltpu


# ----------------------------- model config ---------------------------------
CFG = dict(
    vocab=256,
    hidden=128,
    n_layers=2,
    n_heads=4,
    n_kv_heads=2,
    head_dim=32,
    intermediate=256,
    rope_theta=10000.0,
    rms_eps=1e-5,
)


def _pick_tile(dim, cap, align):
    """Largest tile <= cap that divides dim (aligned), else the full dim."""
    if dim <= cap:
        return dim
    t = (cap // align) * align
    while t >= align:
        if dim % t == 0:
            return t
        t -= align
    return dim


# --------------------------- tiled matmul kernel ------------------------------
def _matmul_kernel(a_ref, b_ref, o_ref, acc_ref):
    @pl.when(pl.program_id(2) == 0)
    def _():
        acc_ref[...] = jnp.zeros_like(acc_ref)

    acc_ref[...] += jnp.dot(a_ref[...], b_ref[...],
                            preferred_element_type=jnp.float32)

    @pl.when(pl.program_id(2) == pl.num_programs(2) - 1)
    def _():
        o_ref[...] = acc_ref[...].astype(o_ref.dtype)


def pallas_matmul(a, b):
    """a: (..., K) @ b: (K, N) -> (..., N) in bf16 (f32 accumulation)."""
    lead = a.shape[:-1]
    K = a.shape[-1]
    N = b.shape[-1]
    M = int(np.prod(lead)) if lead else 1
    a2 = a.reshape(M, K).astype(jnp.bfloat16)
    b2 = b.astype(jnp.bfloat16)
    tm = _pick_tile(M, 256, 8)
    tn = _pick_tile(N, 512, 128)
    tk = _pick_tile(K, 512, 128)
    out = pl.pallas_call(
        _matmul_kernel,
        out_shape=jax.ShapeDtypeStruct((M, N), jnp.bfloat16),
        grid=(M // tm, N // tn, K // tk),
        in_specs=[
            pl.BlockSpec((tm, tk), lambda i, j, k: (i, k)),
            pl.BlockSpec((tk, tn), lambda i, j, k: (k, j)),
        ],
        out_specs=pl.BlockSpec((tm, tn), lambda i, j, k: (i, j)),
        scratch_shapes=[pltpu.VMEM((tm, tn), jnp.float32)],
        compiler_params=pltpu.CompilerParams(
            dimension_semantics=("parallel", "parallel", "arbitrary")),
    )(a2, b2)
    return out.reshape(*lead, N)


# -------------------- tiled matmul + fused residual-add kernel ----------------
def _matmul_residual_kernel(a_ref, b_ref, r_ref, o_ref, acc_ref):
    @pl.when(pl.program_id(2) == 0)
    def _():
        acc_ref[...] = jnp.zeros_like(acc_ref)

    acc_ref[...] += jnp.dot(a_ref[...], b_ref[...],
                            preferred_element_type=jnp.float32)

    @pl.when(pl.program_id(2) == pl.num_programs(2) - 1)
    def _():
        o_ref[...] = (acc_ref[...]
                      + r_ref[...].astype(jnp.float32)).astype(o_ref.dtype)


def pallas_matmul_residual(a, b, res):
    """res + a @ b, residual add fused into the matmul epilogue."""
    lead = a.shape[:-1]
    K = a.shape[-1]
    N = b.shape[-1]
    M = int(np.prod(lead)) if lead else 1
    a2 = a.reshape(M, K).astype(jnp.bfloat16)
    b2 = b.astype(jnp.bfloat16)
    r2 = res.reshape(M, N).astype(jnp.bfloat16)
    tm = _pick_tile(M, 256, 8)
    tn = _pick_tile(N, 512, 128)
    tk = _pick_tile(K, 512, 128)
    out = pl.pallas_call(
        _matmul_residual_kernel,
        out_shape=jax.ShapeDtypeStruct((M, N), jnp.bfloat16),
        grid=(M // tm, N // tn, K // tk),
        in_specs=[
            pl.BlockSpec((tm, tk), lambda i, j, k: (i, k)),
            pl.BlockSpec((tk, tn), lambda i, j, k: (k, j)),
            pl.BlockSpec((tm, tn), lambda i, j, k: (i, j)),
        ],
        out_specs=pl.BlockSpec((tm, tn), lambda i, j, k: (i, j)),
        scratch_shapes=[pltpu.VMEM((tm, tn), jnp.float32)],
        compiler_params=pltpu.CompilerParams(
            dimension_semantics=("parallel", "parallel", "arbitrary")),
    )(a2, b2, r2)
    return out.reshape(*lead, N)


# ----------------------- fused RMSNorm + matmul kernel ------------------------
def _rmsnorm_matmul_kernel(eps, x_ref, g_ref, w_ref, o_ref):
    x = x_ref[...].astype(jnp.float32)                       # (tm, K)
    var = jnp.mean(x * x, axis=-1, keepdims=True)
    xn = (x * jax.lax.rsqrt(var + eps) * g_ref[...]).astype(jnp.bfloat16)
    o_ref[...] = jnp.dot(xn, w_ref[...],
                         preferred_element_type=jnp.float32).astype(o_ref.dtype)


def pallas_rmsnorm_matmul(x, g, w, eps):
    """RMSNorm(x) @ w, fused: no HBM round trip for the normalized activations."""
    lead = x.shape[:-1]
    K = x.shape[-1]
    N = w.shape[-1]
    M = int(np.prod(lead))
    x2 = x.reshape(M, K).astype(jnp.bfloat16)
    g2 = g.reshape(1, K).astype(jnp.float32)
    w2 = w.astype(jnp.bfloat16)
    tm = _pick_tile(M, 256, 8)
    tn = _pick_tile(N, 512, 128)
    out = pl.pallas_call(
        functools.partial(_rmsnorm_matmul_kernel, eps),
        out_shape=jax.ShapeDtypeStruct((M, N), jnp.bfloat16),
        grid=(M // tm, N // tn),
        in_specs=[
            pl.BlockSpec((tm, K), lambda i, j: (i, 0)),
            pl.BlockSpec((1, K), lambda i, j: (0, 0)),
            pl.BlockSpec((K, tn), lambda i, j: (0, j)),
        ],
        out_specs=pl.BlockSpec((tm, tn), lambda i, j: (i, j)),
        compiler_params=pltpu.CompilerParams(
            dimension_semantics=("parallel", "parallel")),
    )(x2, g2, w2)
    return out.reshape(*lead, N)


# -------------- fused RMSNorm + gate/up matmuls + SwiGLU kernel ---------------
def _rmsnorm_swiglu_kernel(eps, x_ref, g_ref, wg_ref, wu_ref, o_ref):
    x = x_ref[...].astype(jnp.float32)
    var = jnp.mean(x * x, axis=-1, keepdims=True)
    xn = (x * jax.lax.rsqrt(var + eps) * g_ref[...]).astype(jnp.bfloat16)
    gt = jnp.dot(xn, wg_ref[...], preferred_element_type=jnp.float32)
    up = jnp.dot(xn, wu_ref[...], preferred_element_type=jnp.float32)
    o_ref[...] = (gt * jax.nn.sigmoid(gt) * up).astype(o_ref.dtype)


def pallas_rmsnorm_swiglu(x, g, wg, wu, eps):
    """silu(RMSNorm(x) @ wg) * (RMSNorm(x) @ wu), all fused in one kernel."""
    lead = x.shape[:-1]
    K = x.shape[-1]
    N = wg.shape[-1]
    M = int(np.prod(lead))
    x2 = x.reshape(M, K).astype(jnp.bfloat16)
    g2 = g.reshape(1, K).astype(jnp.float32)
    tm = _pick_tile(M, 256, 8)
    tn = _pick_tile(N, 512, 128)
    out = pl.pallas_call(
        functools.partial(_rmsnorm_swiglu_kernel, eps),
        out_shape=jax.ShapeDtypeStruct((M, N), jnp.bfloat16),
        grid=(M // tm, N // tn),
        in_specs=[
            pl.BlockSpec((tm, K), lambda i, j: (i, 0)),
            pl.BlockSpec((1, K), lambda i, j: (0, 0)),
            pl.BlockSpec((K, tn), lambda i, j: (0, j)),
            pl.BlockSpec((K, tn), lambda i, j: (0, j)),
        ],
        out_specs=pl.BlockSpec((tm, tn), lambda i, j: (i, j)),
        compiler_params=pltpu.CompilerParams(
            dimension_semantics=("parallel", "parallel")),
    )(x2, g2, wg.astype(jnp.bfloat16), wu.astype(jnp.bfloat16))
    return out.reshape(*lead, N)


# ---------------------- flash-style GQA attention kernel ----------------------
def _attn_kernel(scale, group, D, q_ref, k_ref, v_ref, o_ref,
                 m_scr, l_scr, acc_scr):
    t = pl.program_id(2)

    @pl.when(t == 0)
    def _():
        m_scr[...] = jnp.full_like(m_scr, -1e30)
        l_scr[...] = jnp.zeros_like(l_scr)
        acc_scr[...] = jnp.zeros_like(acc_scr)

    k = k_ref[...]                              # (tkv, D) bf16
    v = v_ref[...]                              # (tkv, D) bf16
    S = q_ref.shape[0]
    tkv = k.shape[0]
    row = jax.lax.broadcasted_iota(jnp.int32, (S, tkv), 0)
    col = jax.lax.broadcasted_iota(jnp.int32, (S, tkv), 1) + t * tkv
    mask = row >= col                           # causal

    # All `group` query heads share this K/V tile (single DMA per kv head).
    for g in range(group):
        qg = q_ref[:, g * D:(g + 1) * D]        # (S, D) bf16
        s = jax.lax.dot_general(
            qg, k, (((1,), (1,)), ((), ())),
            preferred_element_type=jnp.float32) * scale
        s = jnp.where(mask, s, -1e30)
        m_prev = m_scr[g]                       # (S, 1)
        m_new = jnp.maximum(m_prev, jnp.max(s, axis=-1, keepdims=True))
        alpha = jnp.exp(m_prev - m_new)
        p = jnp.exp(s - m_new)
        l_scr[g] = alpha * l_scr[g] + jnp.sum(p, axis=-1, keepdims=True)
        acc_scr[:, g * D:(g + 1) * D] = (
            alpha * acc_scr[:, g * D:(g + 1) * D]
            + jnp.dot(p.astype(v.dtype), v, preferred_element_type=jnp.float32))
        m_scr[g] = m_new

    @pl.when(t == pl.num_programs(2) - 1)
    def _():
        for g in range(group):
            inv = pl.reciprocal(l_scr[g], approx=True)
            acc_scr[:, g * D:(g + 1) * D] = acc_scr[:, g * D:(g + 1) * D] * inv
        o_ref[...] = acc_scr[...].astype(o_ref.dtype)


def pallas_attention(qg, k, v):
    """qg: (B, nKV, S, G*D); k, v: (B, nKV, S, D) -> (B, nKV, S, G*D)."""
    B, nkv, S, GD = qg.shape
    D = k.shape[-1]
    G = GD // D
    scale = 1.0 / math.sqrt(D)
    tkv = _pick_tile(S, 512, 8)
    num_kv = S // tkv
    return pl.pallas_call(
        functools.partial(_attn_kernel, scale, G, D),
        out_shape=jax.ShapeDtypeStruct((B, nkv, S, GD), jnp.bfloat16),
        grid=(B, nkv, num_kv),
        in_specs=[
            pl.BlockSpec((None, None, S, GD), lambda b, h, t: (b, h, 0, 0)),
            pl.BlockSpec((None, None, tkv, D), lambda b, h, t: (b, h, t, 0)),
            pl.BlockSpec((None, None, tkv, D), lambda b, h, t: (b, h, t, 0)),
        ],
        out_specs=pl.BlockSpec((None, None, S, GD), lambda b, h, t: (b, h, 0, 0)),
        scratch_shapes=[
            pltpu.VMEM((G, S, 1), jnp.float32),   # running max per head
            pltpu.VMEM((G, S, 1), jnp.float32),   # running denom per head
            pltpu.VMEM((S, GD), jnp.float32),     # output accumulator
        ],
        compiler_params=pltpu.CompilerParams(
            dimension_semantics=("parallel", "parallel", "arbitrary")),
    )(qg.astype(jnp.bfloat16), k.astype(jnp.bfloat16), v.astype(jnp.bfloat16))


# -------------------- vocab-tiled cross-entropy + accuracy --------------------
def _ce_kernel(V, logits_ref, labels_ref, out_ref, m_scr, l_scr, t_scr, p_scr):
    r = pl.program_id(0)
    vt = pl.program_id(1)
    nvt = pl.num_programs(1)

    @pl.when(jnp.logical_and(r == 0, vt == 0))
    def _():
        out_ref[...] = jnp.zeros_like(out_ref)

    @pl.when(vt == 0)
    def _():
        m_scr[...] = jnp.full_like(m_scr, -1e30)
        l_scr[...] = jnp.zeros_like(l_scr)
        t_scr[...] = jnp.zeros_like(t_scr)
        p_scr[...] = jnp.full_like(p_scr, V)      # "no argmax yet" sentinel

    logits = logits_ref[...].astype(jnp.float32)  # (tm, tv)
    labels = labels_ref[...]                      # (tm, 1) int32
    tm, tv = logits.shape
    col = jax.lax.broadcasted_iota(jnp.int32, (tm, tv), 1) + vt * tv

    # online logsumexp
    tile_max = jnp.max(logits, axis=-1, keepdims=True)
    m_prev = m_scr[...]
    m_new = jnp.maximum(m_prev, tile_max)
    l_scr[...] = (l_scr[...] * jnp.exp(m_prev - m_new)
                  + jnp.sum(jnp.exp(logits - m_new), axis=-1, keepdims=True))
    # target logit (label lands in exactly one vocab tile; -100 matches none)
    onehot = (col == labels).astype(jnp.float32)
    t_scr[...] += jnp.sum(logits * onehot, axis=-1, keepdims=True)
    # first-occurrence argmax across vocab tiles
    tile_pred = jnp.min(jnp.where(logits == tile_max, col, V),
                        axis=-1, keepdims=True).astype(jnp.float32)
    p_scr[...] = jnp.where(tile_max > m_prev, tile_pred, p_scr[...])
    m_scr[...] = m_new

    @pl.when(vt == nvt - 1)
    def _():
        valid = (labels >= 0).astype(jnp.float32)              # ignore_index=-100
        lse = m_scr[...] + jnp.log(l_scr[...])
        nll = (lse - t_scr[...]) * valid
        correct = (p_scr[...] == labels.astype(jnp.float32)).astype(jnp.float32) * valid
        nll_s = jnp.sum(nll)
        cor_s = jnp.sum(correct)
        val_s = jnp.sum(valid)
        rowid = jax.lax.broadcasted_iota(jnp.int32, out_ref.shape, 0)
        upd = jnp.where(rowid == 0, nll_s,
              jnp.where(rowid == 1, cor_s,
              jnp.where(rowid == 2, val_s, 0.0)))
        out_ref[...] += upd


def pallas_cross_entropy(logits2d, labels2d):
    """Returns (sum_nll, sum_correct, sum_valid) scalars."""
    N, V = logits2d.shape
    row_tile = 256
    N_pad = ((N + 7) // 8) * 8
    if N_pad > row_tile:
        N_pad = ((N_pad + row_tile - 1) // row_tile) * row_tile
    if N_pad != N:
        logits2d = jnp.pad(logits2d, ((0, N_pad - N), (0, 0)))
        labels2d = jnp.pad(labels2d, ((0, N_pad - N), (0, 0)),
                           constant_values=-100)
    tm = N_pad if N_pad <= row_tile else row_tile
    tv = 128 if V % 128 == 0 else V
    out = pl.pallas_call(
        functools.partial(_ce_kernel, V),
        out_shape=jax.ShapeDtypeStruct((8, 128), jnp.float32),
        grid=(N_pad // tm, V // tv),
        in_specs=[
            pl.BlockSpec((tm, tv), lambda r, c: (r, c)),
            pl.BlockSpec((tm, 1), lambda r, c: (r, 0)),
        ],
        out_specs=pl.BlockSpec((8, 128), lambda r, c: (0, 0)),
        scratch_shapes=[
            pltpu.VMEM((tm, 1), jnp.float32),   # running max
            pltpu.VMEM((tm, 1), jnp.float32),   # running sum-exp
            pltpu.VMEM((tm, 1), jnp.float32),   # target logit
            pltpu.VMEM((tm, 1), jnp.float32),   # argmax index
        ],
        compiler_params=pltpu.CompilerParams(
            dimension_semantics=("arbitrary", "arbitrary")),
    )(logits2d, labels2d)
    return out[0, 0], out[1, 0], out[2, 0]


# --------------------------- pure-JAX reference ops ---------------------------
# Same dtype policy (bf16 MXU operands, f32 accumulation / softmax / CE math).
def jnp_matmul(a, b):
    lead = a.shape[:-1]
    out = jnp.dot(a.reshape(-1, a.shape[-1]).astype(jnp.bfloat16),
                  b.astype(jnp.bfloat16),
                  preferred_element_type=jnp.float32)
    return out.astype(jnp.bfloat16).reshape(*lead, b.shape[-1])


def jnp_matmul_residual(a, b, res):
    lead = a.shape[:-1]
    out = jnp.dot(a.reshape(-1, a.shape[-1]).astype(jnp.bfloat16),
                  b.astype(jnp.bfloat16),
                  preferred_element_type=jnp.float32)
    out = out + res.reshape(-1, res.shape[-1]).astype(jnp.float32)
    return out.astype(jnp.bfloat16).reshape(*lead, b.shape[-1])


def jnp_rmsnorm_matmul(x, g, w, eps):
    lead = x.shape[:-1]
    K = x.shape[-1]
    xf = x.reshape(-1, K).astype(jnp.float32)
    var = jnp.mean(xf * xf, axis=-1, keepdims=True)
    xn = (xf * jax.lax.rsqrt(var + eps) * g.astype(jnp.float32)[None, :]
          ).astype(jnp.bfloat16)
    out = jnp.dot(xn, w.astype(jnp.bfloat16), preferred_element_type=jnp.float32)
    return out.astype(jnp.bfloat16).reshape(*lead, w.shape[-1])


def jnp_rmsnorm_swiglu(x, g, wg, wu, eps):
    lead = x.shape[:-1]
    K = x.shape[-1]
    xf = x.reshape(-1, K).astype(jnp.float32)
    var = jnp.mean(xf * xf, axis=-1, keepdims=True)
    xn = (xf * jax.lax.rsqrt(var + eps) * g.astype(jnp.float32)[None, :]
          ).astype(jnp.bfloat16)
    gt = jnp.dot(xn, wg.astype(jnp.bfloat16), preferred_element_type=jnp.float32)
    up = jnp.dot(xn, wu.astype(jnp.bfloat16), preferred_element_type=jnp.float32)
    out = (gt * jax.nn.sigmoid(gt) * up).astype(jnp.bfloat16)
    return out.reshape(*lead, wg.shape[-1])


def jnp_attention(qg, k, v):
    B, nkv, S, GD = qg.shape
    D = k.shape[-1]
    G = GD // D
    scale = 1.0 / math.sqrt(D)
    q = qg.reshape(B, nkv, S, G, D).transpose(0, 1, 3, 2, 4)     # (B,nkv,G,S,D)
    s = jnp.einsum("bngqd,bnkd->bngqk",
                   q.astype(jnp.bfloat16), k.astype(jnp.bfloat16),
                   preferred_element_type=jnp.float32) * scale
    row = jnp.arange(S)[:, None]
    col = jnp.arange(S)[None, :]
    s = jnp.where(row >= col, s, -1e30)
    mx = jnp.max(s, axis=-1, keepdims=True)
    p = jnp.exp(s - mx)
    l = jnp.sum(p, axis=-1, keepdims=True)
    o = jnp.einsum("bngqk,bnkd->bngqd",
                   p.astype(jnp.bfloat16), v.astype(jnp.bfloat16),
                   preferred_element_type=jnp.float32) / l
    o = o.transpose(0, 1, 3, 2, 4).reshape(B, nkv, S, GD)
    return o.astype(jnp.bfloat16)


def jnp_cross_entropy(logits2d, labels2d):
    logits = logits2d.astype(jnp.float32)
    labels = labels2d
    N, V = logits.shape
    m = jnp.max(logits, axis=-1, keepdims=True)
    lse = jnp.log(jnp.sum(jnp.exp(logits - m), axis=-1, keepdims=True)) + m
    col = jnp.arange(V)[None, :]
    onehot = (col == labels).astype(jnp.float32)
    tgt = jnp.sum(logits * onehot, axis=-1, keepdims=True)
    valid = (labels >= 0).astype(jnp.float32)
    nll = (lse - tgt) * valid
    pred = jnp.argmax(logits, axis=-1, keepdims=True)
    correct = (pred == labels).astype(jnp.float32) * valid
    return nll.sum(), correct.sum(), valid.sum()


PALLAS_OPS = dict(matmul=pallas_matmul, matmul_residual=pallas_matmul_residual,
                  rmsnorm_matmul=pallas_rmsnorm_matmul,
                  rmsnorm_swiglu=pallas_rmsnorm_swiglu,
                  attention=pallas_attention, cross_entropy=pallas_cross_entropy)
JNP_OPS = dict(matmul=jnp_matmul, matmul_residual=jnp_matmul_residual,
               rmsnorm_matmul=jnp_rmsnorm_matmul,
               rmsnorm_swiglu=jnp_rmsnorm_swiglu,
               attention=jnp_attention, cross_entropy=jnp_cross_entropy)


# ------------------------------- model glue -----------------------------------
def init_params(key, cfg):
    H, V, I = cfg["hidden"], cfg["vocab"], cfg["intermediate"]
    nh, nkv, hd = cfg["n_heads"], cfg["n_kv_heads"], cfg["head_dim"]

    def nrm(k, shape):
        return jax.random.normal(k, shape, jnp.float32) * 0.02

    keys = jax.random.split(key, 2 + cfg["n_layers"] * 7)
    params = {
        "embed": nrm(keys[0], (V, H)),
        "lm_head": nrm(keys[1], (H, V)),
        "final_norm": jnp.ones((H,), jnp.float32),
        "layers": [],
    }
    for l in range(cfg["n_layers"]):
        ks = keys[2 + l * 7: 2 + (l + 1) * 7]
        params["layers"].append(dict(
            wq=nrm(ks[0], (H, nh * hd)),
            wk=nrm(ks[1], (H, nkv * hd)),
            wv=nrm(ks[2], (H, nkv * hd)),
            wo=nrm(ks[3], (nh * hd, H)),
            wg=nrm(ks[4], (H, I)),
            wu=nrm(ks[5], (H, I)),
            wd=nrm(ks[6], (I, H)),
            n1=jnp.ones((H,), jnp.float32),
            n2=jnp.ones((H,), jnp.float32),
        ))
    return params


def make_rope_tables(S, hd, theta):
    """cos/sin tables, shape (1, S, 1, hd); computed once per forward."""
    inv = 1.0 / (theta ** (jnp.arange(0, hd, 2, dtype=jnp.float32) / hd))
    pos = jnp.arange(S, dtype=jnp.float32)
    freqs = pos[:, None] * inv[None, :]
    emb = jnp.concatenate([freqs, freqs], axis=-1)            # (S, hd)
    cos = jnp.cos(emb)[None, :, None, :]
    sin = jnp.sin(emb)[None, :, None, :]
    return cos, sin


def apply_rope(q, k, cos, sin):
    """q, k: (B, S, n_heads, hd) -> RoPE applied along the S axis."""
    hd = q.shape[-1]

    def rot(x):
        x1, x2 = x[..., : hd // 2], x[..., hd // 2:]
        return jnp.concatenate([-x2, x1], axis=-1)

    qf = q.astype(jnp.float32)
    kf = k.astype(jnp.float32)
    qo = (qf * cos + rot(qf) * sin).astype(jnp.bfloat16)
    ko = (kf * cos + rot(kf) * sin).astype(jnp.bfloat16)
    return qo, ko


def forward(params, input_ids, cfg, ops):
    B, S = input_ids.shape
    nh, nkv, hd = cfg["n_heads"], cfg["n_kv_heads"], cfg["head_dim"]
    G = nh // nkv
    eps = cfg["rms_eps"]
    cos, sin = make_rope_tables(S, hd, cfg["rope_theta"])        # hoisted
    x = params["embed"][input_ids].astype(jnp.bfloat16)          # (B, S, H)
    for lp in params["layers"]:
        # Fused RMSNorm + (Q|K|V) projection: one read of the activations.
        w_qkv = jnp.concatenate([lp["wq"], lp["wk"], lp["wv"]], axis=1)
        qkv = ops["rmsnorm_matmul"](x, lp["n1"], w_qkv, eps)
        q = qkv[..., : nh * hd].reshape(B, S, nh, hd)
        k = qkv[..., nh * hd:(nh + nkv) * hd].reshape(B, S, nkv, hd)
        v = qkv[..., (nh + nkv) * hd:].reshape(B, S, nkv, hd)
        q, k = apply_rope(q, k, cos, sin)
        # GQA layout: pack the `group` query heads of each KV head on lanes.
        qg = q.reshape(B, S, nkv, G * hd).transpose(0, 2, 1, 3)  # (B,nkv,S,G*hd)
        kt = k.transpose(0, 2, 1, 3)                             # (B,nkv,S,hd)
        vt = v.transpose(0, 2, 1, 3)
        a = ops["attention"](qg, kt, vt)                         # (B,nkv,S,G*hd)
        a = a.transpose(0, 2, 1, 3).reshape(B, S, nh * hd)
        # Output projection with the residual add fused into the epilogue.
        x = ops["matmul_residual"](a, lp["wo"], x)
        # Fused RMSNorm + gate/up matmuls + SwiGLU.
        m = ops["rmsnorm_swiglu"](x, lp["n2"], lp["wg"], lp["wu"], eps)
        # Down projection with the residual add fused into the epilogue.
        x = ops["matmul_residual"](m, lp["wd"], x)
    # Fused final RMSNorm + lm_head.
    logits = ops["rmsnorm_matmul"](x, params["final_norm"], params["lm_head"], eps)
    return logits                                                # (B, S, V) bf16


def compute_loss(params, input_ids, labels, cfg, ops):
    logits = forward(params, input_ids, cfg, ops)
    shift_logits = logits[:, :-1, :]
    shift_labels = labels[:, 1:]
    Bq, Sm1, V = shift_logits.shape
    N = Bq * Sm1
    nll_sum, correct_sum, valid_sum = ops["cross_entropy"](
        shift_logits.reshape(N, V), shift_labels.reshape(N, 1).astype(jnp.int32))
    loss = nll_sum / valid_sum
    token_accuracy = correct_sum / valid_sum
    return dict(
        logits=logits.astype(jnp.float32),
        loss=loss,
        token_accuracy=token_accuracy,
        total_correct=correct_sum,
        total_loss=loss * valid_sum,
        total_tokens=valid_sum,
    )


# ---------------------------------- main ---------------------------------------
if __name__ == "__main__":
    cfg = CFG
    B, S = 2, 8
    key = jax.random.PRNGKey(0)
    pkey, dkey = jax.random.split(key)
    params = init_params(pkey, cfg)

    input_ids = jax.random.randint(dkey, (B, S), 0, cfg["vocab"], dtype=jnp.int32)
    labels = input_ids.at[:, :2].set(-100)   # mask a small "prompt" prefix

    pallas_fn = jax.jit(lambda p, i, l: compute_loss(p, i, l, cfg, PALLAS_OPS))
    ref_fn = jax.jit(lambda p, i, l: compute_loss(p, i, l, cfg, JNP_OPS))

    out = pallas_fn(params, input_ids, labels)
    jax.block_until_ready(out)

    ref = ref_fn(params, input_ids, labels)
    jax.block_until_ready(ref)

    np.testing.assert_allclose(np.asarray(out["logits"]), np.asarray(ref["logits"]),
                               rtol=5e-2, atol=2e-2)
    np.testing.assert_allclose(float(out["loss"]), float(ref["loss"]),
                               rtol=2e-2, atol=2e-2)
    assert bool(jnp.isfinite(out["loss"]))
    assert float(out["total_tokens"]) == float(B * (S - 1) - 2 * 1)  # two masked shifts
    acc = float(out["token_accuracy"])
    assert 0.0 <= acc <= 1.0

    print("KERNEL_OK")
</pallas_src>

<mosaic_0001>
module attributes {stable_mosaic.version = 11 : i64} {
  func.func @_rmsnorm_matmul_kernel(%arg0: i32, %arg1: i32, %arg2: memref<16x128xbf16, #tpu.memory_space<vmem>>, %arg3: memref<1x128xf32, #tpu.memory_space<vmem>>, %arg4: memref<128x256xbf16, #tpu.memory_space<vmem>>, %arg5: memref<16x256xbf16, #tpu.memory_space<vmem>>) attributes {dimension_semantics = [#tpu.dimension_semantics<parallel>, #tpu.dimension_semantics<parallel>], iteration_bounds = array<i64: 1, 1>, scalar_prefetch = 0 : i64, scratch_operands = 0 : i64, tpu.core_type = #tpu.core_type<tc>, window_params = [{transform_indices = @transform_0, window_bounds = array<i64: 16, 128>}, {pipeline_mode = #tpu.pipeline_mode<synchronous>, transform_indices = @transform_1, window_bounds = array<i64: 1, 128>}, {transform_indices = @transform_2, window_bounds = array<i64: 128, 256>}, {transform_indices = @transform_3, window_bounds = array<i64: 16, 256>}]} {
    %c0 = arith.constant 0 : index
    %c0_0 = arith.constant 0 : index
    %0 = vector.load %arg2[%c0, %c0_0] : memref<16x128xbf16, #tpu.memory_space<vmem>>, vector<16x128xbf16>
    %1 = arith.extf %0 : vector<16x128xbf16> to vector<16x128xf32>
    %2 = arith.mulf %1, %1 : vector<16x128xf32>
    %cst = arith.constant dense<0.000000e+00> : vector<16xf32>
    %3 = vector.multi_reduction <add>, %2, %cst [1] : vector<16x128xf32> to vector<16xf32>
    %4 = vector.shape_cast %3 : vector<16xf32> to vector<16x1xf32>
    %cst_1 = arith.constant 1.280000e+02 : f32
    %5 = vector.broadcast %cst_1 : f32 to vector<16x1xf32>
    %6 = arith.divf %4, %5 : vector<16x1xf32>
    %cst_2 = arith.constant 9.99999974E-6 : f32
    %7 = vector.broadcast %cst_2 : f32 to vector<16x1xf32>
    %8 = arith.addf %6, %7 : vector<16x1xf32>
    %9 = math.rsqrt %8 : vector<16x1xf32>
    %10 = vector.broadcast %9 : vector<16x1xf32> to vector<16x128xf32>
    %11 = arith.mulf %1, %10 : vector<16x128xf32>
    %c0_3 = arith.constant 0 : index
    %c0_4 = arith.constant 0 : index
    %12 = vector.load %arg3[%c0_3, %c0_4] : memref<1x128xf32, #tpu.memory_space<vmem>>, vector<1x128xf32>
    %13 = vector.broadcast %12 : vector<1x128xf32> to vector<16x128xf32>
    %14 = arith.mulf %11, %13 : vector<16x128xf32>
    %15 = arith.truncf %14 : vector<16x128xf32> to vector<16x128xbf16>
    %c0_5 = arith.constant 0 : index
    %c0_6 = arith.constant 0 : index
    %16 = vector.load %arg4[%c0_5, %c0_6] : memref<128x256xbf16, #tpu.memory_space<vmem>>, vector<128x256xbf16>
    %cst_7 = arith.constant dense<0.000000e+00> : vector<16x256xf32>
    %17 = tpu.matmul %15, %16, %cst_7 {dimension_numbers = #tpu.dot_dimension_numbers<[1], [0], [0], [1], [0, 0, 1, 1], [], []>} : vector<16x128xbf16>, vector<128x256xbf16>, vector<16x256xf32> -> vector<16x256xf32>
    %18 = arith.truncf %17 : vector<16x256xf32> to vector<16x256xbf16>
    %c0_8 = arith.constant 0 : index
    %c0_9 = arith.constant 0 : index
    %19 = vector.load %arg5[%c0_8, %c0_9] : memref<16x256xbf16, #tpu.memory_space<vmem>>, vector<16x256xbf16>
    tpu.vector_store %arg5[%c0_8, %c0_9], %18 {strides = array<i32>} : memref<16x256xbf16, #tpu.memory_space<vmem>>, vector<16x256xbf16>,
    return
  }
  func.func @transform_0(%arg0: i32, %arg1: i32) -> (i32, i32) {
    %c0_i32 = arith.constant 0 : i32
    %c0_i32_0 = arith.constant 0 : i32
    return %arg0, %c0_i32 : i32, i32
  }
  func.func @transform_1(%arg0: i32, %arg1: i32) -> (i32, i32) {
    %c0_i32 = arith.constant 0 : i32
    %c0_i32_0 = arith.constant 0 : i32
    %c0_i32_1 = arith.constant 0 : i32
    return %c0_i32, %c0_i32_0 : i32, i32
  }
  func.func @transform_2(%arg0: i32, %arg1: i32) -> (i32, i32) {
    %c0_i32 = arith.constant 0 : i32
    %c0_i32_0 = arith.constant 0 : i32
    return %c0_i32, %arg1 : i32, i32
  }
  func.func @transform_3(%arg0: i32, %arg1: i32) -> (i32, i32) {
    %c0_i32 = arith.constant 0 : i32
    return %arg0, %arg1 : i32, i32
  }
}

module attributes {stable_mosaic.version = 11 : i64} {
  func.func @_attn_kernel(%arg0: i32, %arg1: i32, %arg2: i32, %arg3: memref<1x1x8x64xbf16, #tpu.memory_space<vmem>>, %arg4: memref<1x1x8x32xbf16, #tpu.memory_space<vmem>>, %arg5: memref<1x1x8x32xbf16, #tpu.memory_space<vmem>>, %arg6: memref<1x1x8x64xbf16, #tpu.memory_space<vmem>>, %arg7: memref<2x8x1xf32, #tpu.memory_space<vmem>>, %arg8: memref<2x8x1xf32, #tpu.memory_space<vmem>>, %arg9: memref<8x64xf32, #tpu.memory_space<vmem>>) attributes {dimension_semantics = [#tpu.dimension_semantics<parallel>, #tpu.dimension_semantics<parallel>, #tpu.dimension_semantics<arbitrary>], iteration_bounds = array<i64: 2, 2, 1>, scalar_prefetch = 0 : i64, scratch_operands = 3 : i64, tpu.core_type = #tpu.core_type<tc>, window_params = [{transform_indices = @transform_0, window_bounds = array<i64: 1, 1, 8, 64>}, {transform_indices = @transform_1, window_bounds = array<i64: 1, 1, 8, 32>}, {transform_indices = @transform_2, window_bounds = array<i64: 1, 1, 8, 32>}, {transform_indices = @transform_3, window_bounds = array<i64: 1, 1, 8, 64>}]} {
    %c0_i32 = arith.constant 0 : i32
    %0 = arith.cmpi eq, %arg2, %c0_i32 : i32
    %1 = arith.extui %0 : i1 to i32
    %c0_i32_0 = arith.constant 0 : i32
    %2 = arith.cmpi ne, %1, %c0_i32_0 : i32
    scf.if %2 {
      %cst_59 = arith.constant -1.000000e+30 : f32
      %88 = vector.broadcast %cst_59 : f32 to vector<2x8x1xf32>
      %c0_60 = arith.constant 0 : index
      %c0_61 = arith.constant 0 : index
      %c0_62 = arith.constant 0 : index
      %89 = vector.load %arg7[%c0_60, %c0_61, %c0_62] : memref<2x8x1xf32, #tpu.memory_space<vmem>>, vector<2x8x1xf32>
      tpu.vector_store %arg7[%c0_60, %c0_61, %c0_62], %88 {strides = array<i32>} : memref<2x8x1xf32, #tpu.memory_space<vmem>>, vector<2x8x1xf32>,
      %cst_63 = arith.constant 0.000000e+00 : f32
      %90 = vector.broadcast %cst_63 : f32 to vector<2x8x1xf32>
      %c0_64 = arith.constant 0 : index
      %c0_65 = arith.constant 0 : index
      %c0_66 = arith.constant 0 : index
      %91 = vector.load %arg8[%c0_64, %c0_65, %c0_66] : memref<2x8x1xf32, #tpu.memory_space<vmem>>, vector<2x8x1xf32>
      tpu.vector_store %arg8[%c0_64, %c0_65, %c0_66], %90 {strides = array<i32>} : memref<2x8x1xf32, #tpu.memory_space<vmem>>, vector<2x8x1xf32>,
      %cst_67 = arith.constant 0.000000e+00 : f32
      %92 = vector.broadcast %cst_67 : f32 to vector<8x64xf32>
      %c0_68 = arith.constant 0 : index
      %c0_69 = arith.constant 0 : index
      %93 = vector.load %arg9[%c0_68, %c0_69] : memref<8x64xf32, #tpu.memory_space<vmem>>, vector<8x64xf32>
      tpu.vector_store %arg9[%c0_68, %c0_69], %92 {strides = array<i32>} : memref<8x64xf32, #tpu.memory_space<vmem>>, vector<8x64xf32>,
    } else {
    }
    %c0 = arith.constant 0 : index
    %c0_1 = arith.constant 0 : index
    %c0_2 = arith.constant 0 : index
    %c0_3 = arith.constant 0 : index
    %3 = vector.load %arg4[%c0, %c0_1, %c0_2, %c0_3] : memref<1x1x8x32xbf16, #tpu.memory_space<vmem>>, vector<1x1x8x32xbf16>
    %4 = vector.shape_cast %3 : vector<1x1x8x32xbf16> to vector<8x32xbf16>
    %c0_4 = arith.constant 0 : index
    %c0_5 = arith.constant 0 : index
    %c0_6 = arith.constant 0 : index
    %c0_7 = arith.constant 0 : index
    %5 = vector.load %arg5[%c0_4, %c0_5, %c0_6, %c0_7] : memref<1x1x8x32xbf16, #tpu.memory_space<vmem>>, vector<1x1x8x32xbf16>
    %6 = vector.shape_cast %5 : vector<1x1x8x32xbf16> to vector<8x32xbf16>
    %7 = tpu.iota {dimensions = array<i32: 0>} : vector<8x8xi32>
    %8 = tpu.iota {dimensions = array<i32: 1>} : vector<8x8xi32>
    %c8_i32 = arith.constant 8 : i32
    %9 = arith.muli %arg2, %c8_i32 : i32
    %10 = vector.broadcast %9 : i32 to vector<8x8xi32>
    %11 = arith.addi %8, %10 : vector<8x8xi32>
    %12 = arith.cmpi sge, %7, %11 : vector<8x8xi32>
    %c0_8 = arith.constant 0 : index
    %c0_9 = arith.constant 0 : index
    %c0_10 = arith.constant 0 : index
    %c0_11 = arith.constant 0 : index
    %13 = vector.load %arg3[%c0_8, %c0_9, %c0_10, %c0_11] : memref<1x1x8x64xbf16, #tpu.memory_space<vmem>>, vector<1x1x8x32xbf16>
    %14 = vector.shape_cast %13 : vector<1x1x8x32xbf16> to vector<8x32xbf16>
    %cst = arith.constant dense<0.000000e+00> : vector<8x8xf32>
    %15 = tpu.matmul %14, %4, %cst {dimension_numbers = #tpu.dot_dimension_numbers<[1], [1], [0], [0], [0, 0, 1, 0], [], []>} : vector<8x32xbf16>, vector<8x32xbf16>, vector<8x8xf32> -> vector<8x8xf32>
    %cst_12 = arith.constant 0.176776692 : f32
    %16 = vector.broadcast %cst_12 : f32 to vector<8x8xf32>
    %17 = arith.mulf %15, %16 : vector<8x8xf32>
    %cst_13 = arith.constant -1.000000e+30 : f32
    %18 = vector.broadcast %cst_13 : f32 to vector<8x8xf32>
    %19 = arith.select %12, %17, %18 : vector<8x8xi1>, vector<8x8xf32>
    %c0_14 = arith.constant 0 : index
    %c0_15 = arith.constant 0 : index
    %c0_16 = arith.constant 0 : index
    %20 = vector.load %arg7[%c0_14, %c0_15, %c0_16] : memref<2x8x1xf32, #tpu.memory_space<vmem>>, vector<1x8x1xf32>
    %21 = vector.shape_cast %20 : vector<1x8x1xf32> to vector<8x1xf32>
    %cst_17 = arith.constant dense<0xFF800000> : vector<8xf32>
    %22 = vector.multi_reduction <maximumf>, %19, %cst_17 [1] : vector<8x8xf32> to vector<8xf32>
    %23 = vector.shape_cast %22 : vector<8xf32> to vector<8x1xf32>
    %24 = arith.maximumf %21, %23 : vector<8x1xf32>
    %25 = arith.subf %21, %24 : vector<8x1xf32>
    %26 = math.exp %25 : vector<8x1xf32>
    %27 = vector.broadcast %24 : vector<8x1xf32> to vector<8x8xf32>
    %28 = arith.subf %19, %27 : vector<8x8xf32>
    %29 = math.exp %28 : vector<8x8xf32>
    %c0_18 = arith.constant 0 : index
    %c0_19 = arith.constant 0 : index
    %c0_20 = arith.constant 0 : index
    %30 = vector.load %arg8[%c0_18, %c0_19, %c0_20] : memref<2x8x1xf32, #tpu.memory_space<vmem>>, vector<1x8x1xf32>
    %31 = vector.shape_cast %30 : vector<1x8x1xf32> to vector<8x1xf32>
    %32 = arith.mulf %26, %31 : vector<8x1xf32>
    %cst_21 = arith.constant dense<0.000000e+00> : vector<8xf32>
    %33 = vector.multi_reduction <add>, %29, %cst_21 [1] : vector<8x8xf32> to vector<8xf32>
    %34 = vector.shape_cast %33 : vector<8xf32> to vector<8x1xf32>
    %35 = arith.addf %32, %34 : vector<8x1xf32>
    %c0_22 = arith.constant 0 : index
    %c0_23 = arith.constant 0 : index
    %c0_24 = arith.constant 0 : index
    %36 = vector.load %arg8[%c0_22, %c0_23, %c0_24] : memref<2x8x1xf32, #tpu.memory_space<vmem>>, vector<1x8x1xf32>
    %37 = vector.shape_cast %36 : vector<1x8x1xf32> to vector<8x1xf32>
    %38 = vector.shape_cast %35 : vector<8x1xf32> to vector<1x8x1xf32>
    tpu.vector_store %arg8[%c0_22, %c0_23, %c0_24], %38 {strides = array<i32>} : memref<2x8x1xf32, #tpu.memory_space<vmem>>, vector<1x8x1xf32>,
    %c0_25 = arith.constant 0 : index
    %c0_26 = arith.constant 0 : index
    %39 = vector.load %arg9[%c0_25, %c0_26] : memref<8x64xf32, #tpu.memory_space<vmem>>, vector<8x32xf32>
    %40 = vector.broadcast %26 : vector<8x1xf32> to vector<8x32xf32>
    %41 = arith.mulf %40, %39 : vector<8x32xf32>
    %42 = arith.truncf %29 : vector<8x8xf32> to vector<8x8xbf16>
    %cst_27 = arith.constant dense<0.000000e+00> : vector<8x32xf32>
    %43 = tpu.matmul %42, %6, %cst_27 {dimension_numbers = #tpu.dot_dimension_numbers<[1], [0], [0], [1], [0, 0, 1, 1], [], []>} : vector<8x8xbf16>, vector<8x32xbf16>, vector<8x32xf32> -> vector<8x32xf32>
    %44 = arith.addf %41, %43 : vector<8x32xf32>
    %c0_28 = arith.constant 0 : index
    %c0_29 = arith.constant 0 : index
    %45 = vector.load %arg9[%c0_28, %c0_29] : memref<8x64xf32, #tpu.memory_space<vmem>>, vector<8x32xf32>
    tpu.vector_store %arg9[%c0_28, %c0_29], %44 {strides = array<i32>} : memref<8x64xf32, #tpu.memory_space<vmem>>, vector<8x32xf32>,
    %c0_30 = arith.constant 0 : index
    %c0_31 = arith.constant 0 : index
    %c0_32 = arith.constant 0 : index
    %46 = vector.load %arg7[%c0_30, %c0_31, %c0_32] : memref<2x8x1xf32, #tpu.memory_space<vmem>>, vector<1x8x1xf32>
    %47 = vector.shape_cast %46 : vector<1x8x1xf32> to vector<8x1xf32>
    %48 = vector.shape_cast %24 : vector<8x1xf32> to vector<1x8x1xf32>
    tpu.vector_store %arg7[%c0_30, %c0_31, %c0_32], %48 {strides = array<i32>} : memref<2x8x1xf32, #tpu.memory_space<vmem>>, vector<1x8x1xf32>,
    %c0_33 = arith.constant 0 : index
    %c0_34 = arith.constant 0 : index
    %c0_35 = arith.constant 0 : index
    %c32 = arith.constant 32 : index
    %49 = vector.load %arg3[%c0_33, %c0_34, %c0_35, %c32] : memref<1x1x8x64xbf16, #tpu.memory_space<vmem>>, vector<1x1x8x32xbf16>
    %50 = vector.shape_cast %49 : vector<1x1x8x32xbf16> to vector<8x32xbf16>
    %cst_36 = arith.constant dense<0.000000e+00> : vector<8x8xf32>
    %51 = tpu.matmul %50, %4, %cst_36 {dimension_numbers = #tpu.dot_dimension_numbers<[1], [1], [0], [0], [0, 0, 1, 0], [], []>} : vector<8x32xbf16>, vector<8x32xbf16>, vector<8x8xf32> -> vector<8x8xf32>
    %cst_37 = arith.constant 0.176776692 : f32
    %52 = vector.broadcast %cst_37 : f32 to vector<8x8xf32>
    %53 = arith.mulf %51, %52 : vector<8x8xf32>
    %cst_38 = arith.constant -1.000000e+30 : f32
    %54 = vector.broadcast %cst_38 : f32 to vector<8x8xf32>
    %55 = arith.select %12, %53, %54 : vector<8x8xi1>, vector<8x8xf32>
    %c1 = arith.constant 1 : index
    %c0_39 = arith.constant 0 : index
    %c0_40 = arith.constant 0 : index
    %56 = vector.load %arg7[%c1, %c0_39, %c0_40] : memref<2x8x1xf32, #tpu.memory_space<vmem>>, vector<1x8x1xf32>
    %57 = vector.shape_cast %56 : vector<1x8x1xf32> to vector<8x1xf32>
    %cst_41 = arith.constant dense<0xFF800000> : vector<8xf32>
    %58 = vector.multi_reduction <maximumf>, %55, %cst_41 [1] : vector<8x8xf32> to vector<8xf32>
    %59 = vector.shape_cast %58 : vector<8xf32> to vector<8x1xf32>
    %60 = arith.maximumf %57, %59 : vector<8x1xf32>
    %61 = arith.subf %57, %60 : vector<8x1xf32>
    %62 = math.exp %61 : vector<8x1xf32>
    %63 = vector.broadcast %60 : vector<8x1xf32> to vector<8x8xf32>
    %64 = arith.subf %55, %63 : vector<8x8xf32>
    %65 = math.exp %64 : vector<8x8xf32>
    %c1_42 = arith.constant 1 : index
    %c0_43 = arith.constant 0 : index
    %c0_44 = arith.constant 0 : index
    %66 = vector.load %arg8[%c1_42, %c0_43, %c0_44] : memref<2x8x1xf32, #tpu.memory_space<vmem>>, vector<1x8x1xf32>
    %67 = vector.shape_cast %66 : vector<1x8x1xf32> to vector<8x1xf32>
    %68 = arith.mulf %62, %67 : vector<8x1xf32>
    %cst_45 = arith.constant dense<0.000000e+00> : vector<8xf32>
    %69 = vector.multi_reduction <add>, %65, %cst_45 [1] : vector<8x8xf32> to vector<8xf32>
    %70 = vector.shape_cast %69 : vector<8xf32> to vector<8x1xf32>
    %71 = arith.addf %68, %70 : vector<8x1xf32>
    %c1_46 = arith.constant 1 : index
    %c0_47 = arith.constant 0 : index
    %c0_48 = arith.constant 0 : index
    %72 = vector.load %arg8[%c1_46, %c0_47, %c0_48] : memref<2x8x1xf32, #tpu.memory_space<vmem>>, vector<1x8x1xf32>
    %73 = vector.shape_cast %72 : vector<1x8x1xf32> to vector<8x1xf32>
    %74 = vector.shape_cast %71 : vector<8x1xf32> to vector<1x8x1xf32>
    tpu.vector_store %arg8[%c1_46, %c0_47, %c0_48], %74 {strides = array<i32>} : memref<2x8x1xf32, #tpu.memory_space<vmem>>, vector<1x8x1xf32>,
    %c0_49 = arith.constant 0 : index
    %c32_50 = arith.constant 32 : index
    %75 = vector.load %arg9[%c0_49, %c32_50] : memref<8x64xf32, #tpu.memory_space<vmem>>, vector<8x32xf32>
    %76 = vector.broadcast %62 : vector<8x1xf32> to vector<8x32xf32>
    %77 = arith.mulf %76, %75 : vector<8x32xf32>
    %78 = arith.truncf %65 : vector<8x8xf32> to vector<8x8xbf16>
    %cst_51 = arith.constant dense<0.000000e+00> : vector<8x32xf32>
    %79 = tpu.matmul %78, %6, %cst_51 {dimension_numbers = #tpu.dot_dimension_numbers<[1], [0], [0], [1], [0, 0, 1, 1], [], []>} : vector<8x8xbf16>, vector<8x32xbf16>, vector<8x32xf32> -> vector<8x32xf32>
    %80 = arith.addf %77, %79 : vector<8x32xf32>
    %c0_52 = arith.constant 0 : index
    %c32_53 = arith.constant 32 : index
    %81 = vector.load %arg9[%c0_52, %c32_53] : memref<8x64xf32, #tpu.memory_space<vmem>>, vector<8x32xf32>
    tpu.vector_store %arg9[%c0_52, %c32_53], %80 {strides = array<i32>} : memref<8x64xf32, #tpu.memory_space<vmem>>, vector<8x32xf32>,
    %c1_54 = arith.constant 1 : index
    %c0_55 = arith.constant 0 : index
    %c0_56 = arith.constant 0 : index
    %82 = vector.load %arg7[%c1_54, %c0_55, %c0_56] : memref<2x8x1xf32, #tpu.memory_space<vmem>>, vector<1x8x1xf32>
    %83 = vector.shape_cast %82 : vector<1x8x1xf32> to vector<8x1xf32>
    %84 = vector.shape_cast %60 : vector<8x1xf32> to vector<1x8x1xf32>
    tpu.vector_store %arg7[%c1_54, %c0_55, %c0_56], %84 {strides = array<i32>} : memref<2x8x1xf32, #tpu.memory_space<vmem>>, vector<1x8x1xf32>,
    %c0_i32_57 = arith.constant 0 : i32
    %85 = arith.cmpi eq, %arg2, %c0_i32_57 : i32
    %86 = arith.extui %85 : i1 to i32
    %c0_i32_58 = arith.constant 0 : i32
    %87 = arith.cmpi ne, %86, %c0_i32_58 : i32
    scf.if %87 {
      %c0_59 = arith.constant 0 : index
      %c0_60 = arith.constant 0 : index
      %c0_61 = arith.constant 0 : index
      %88 = vector.load %arg8[%c0_59, %c0_60, %c0_61] : memref<2x8x1xf32, #tpu.memory_space<vmem>>, vector<1x8x1xf32>
      %89 = vector.shape_cast %88 : vector<1x8x1xf32> to vector<8x1xf32>
      %90 = tpu.reciprocal %89 {approx = true} : vector<8x1xf32> -> vector<8x1xf32>
      %c0_62 = arith.constant 0 : index
      %c0_63 = arith.constant 0 : index
      %91 = vector.load %arg9[%c0_62, %c0_63] : memref<8x64xf32, #tpu.memory_space<vmem>>, vector<8x32xf32>
      %92 = vector.broadcast %90 : vector<8x1xf32> to vector<8x32xf32>
      %93 = arith.mulf %91, %92 : vector<8x32xf32>
      %c0_64 = arith.constant 0 : index
      %c0_65 = arith.constant 0 : index
      %94 = vector.load %arg9[%c0_64, %c0_65] : memref<8x64xf32, #tpu.memory_space<vmem>>, vector<8x32xf32>
      tpu.vector_store %arg9[%c0_64, %c0_65], %93 {strides = array<i32>} : memref<8x64xf32, #tpu.memory_space<vmem>>, vector<8x32xf32>,
      %c1_66 = arith.constant 1 : index
      %c0_67 = arith.constant 0 : index
      %c0_68 = arith.constant 0 : index
      %95 = vector.load %arg8[%c1_66, %c0_67, %c0_68] : memref<2x8x1xf32, #tpu.memory_space<vmem>>, vector<1x8x1xf32>
      %96 = vector.shape_cast %95 : vector<1x8x1xf32> to vector<8x1xf32>
      %97 = tpu.reciprocal %96 {approx = true} : vector<8x1xf32> -> vector<8x1xf32>
      %c0_69 = arith.constant 0 : index
      %c32_70 = arith.constant 32 : index
      %98 = vector.load %arg9[%c0_69, %c32_70] : memref<8x64xf32, #tpu.memory_space<vmem>>, vector<8x32xf32>
      %99 = vector.broadcast %97 : vector<8x1xf32> to vector<8x32xf32>
      %100 = arith.mulf %98, %99 : vector<8x32xf32>
      %c0_71 = arith.constant 0 : index
      %c32_72 = arith.constant 32 : index
      %101 = vector.load %arg9[%c0_71, %c32_72] : memref<8x64xf32, #tpu.memory_space<vmem>>, vector<8x32xf32>
      tpu.vector_store %arg9[%c0_71, %c32_72], %100 {strides = array<i32>} : memref<8x64xf32, #tpu.memory_space<vmem>>, vector<8x32xf32>,
      %c0_73 = arith.constant 0 : index
      %c0_74 = arith.constant 0 : index
      %102 = vector.load %arg9[%c0_73, %c0_74] : memref<8x64xf32, #tpu.memory_space<vmem>>, vector<8x64xf32>
      %103 = arith.truncf %102 : vector<8x64xf32> to vector<8x64xbf16>
      %c0_75 = arith.constant 0 : index
      %c0_76 = arith.constant 0 : index
      %c0_77 = arith.constant 0 : index
      %c0_78 = arith.constant 0 : index
      %104 = vector.load %arg6[%c0_75, %c0_76, %c0_77, %c0_78] : memref<1x1x8x64xbf16, #tpu.memory_space<vmem>>, vector<1x1x8x64xbf16>
      %105 = vector.shape_cast %104 : vector<1x1x8x64xbf16> to vector<8x64xbf16>
      %106 = vector.shape_cast %103 : vector<8x64xbf16> to vector<1x1x8x64xbf16>
      tpu.vector_store %arg6[%c0_75, %c0_76, %c0_77, %c0_78], %106 {strides = array<i32>} : memref<1x1x8x64xbf16, #tpu.memory_space<vmem>>, vector<1x1x8x64xbf16>,
    } else {
    }
    return
  }
  func.func @transform_0(%arg0: i32, %arg1: i32, %arg2: i32) -> (i32, i32, i32, i32) {
    %c0_i32 = arith.constant 0 : i32
    %c0_i32_0 = arith.constant 0 : i32
    %c0_i32_1 = arith.constant 0 : i32
    return %arg0, %arg1, %c0_i32, %c0_i32_0 : i32, i32, i32, i32
  }
  func.func @transform_1(%arg0: i32, %arg1: i32, %arg2: i32) -> (i32, i32, i32, i32) {
    %c0_i32 = arith.constant 0 : i32
    %c0_i32_0 = arith.constant 0 : i32
    return %arg0, %arg1, %arg2, %c0_i32 : i32, i32, i32, i32
  }
  func.func @transform_2(%arg0: i32, %arg1: i32, %arg2: i32) -> (i32, i32, i32, i32) {
    %c0_i32 = arith.constant 0 : i32
    %c0_i32_0 = arith.constant 0 : i32
    return %arg0, %arg1, %arg2, %c0_i32 : i32, i32, i32, i32
  }
  func.func @transform_3(%arg0: i32, %arg1: i32, %arg2: i32) -> (i32, i32, i32, i32) {
    %c0_i32 = arith.constant 0 : i32
    %c0_i32_0 = arith.constant 0 : i32
    %c0_i32_1 = arith.constant 0 : i32
    return %arg0, %arg1, %c0_i32, %c0_i32_0 : i32, i32, i32, i32
  }
}

module attributes {stable_mosaic.version = 11 : i64} {
  func.func @_matmul_residual_kernel(%arg0: i32, %arg1: i32, %arg2: i32, %arg3: memref<16x128xbf16, #tpu.memory_space<vmem>>, %arg4: memref<128x128xbf16, #tpu.memory_space<vmem>>, %arg5: memref<16x128xbf16, #tpu.memory_space<vmem>>, %arg6: memref<16x128xbf16, #tpu.memory_space<vmem>>, %arg7: memref<16x128xf32, #tpu.memory_space<vmem>>) attributes {dimension_semantics = [#tpu.dimension_semantics<parallel>, #tpu.dimension_semantics<parallel>, #tpu.dimension_semantics<arbitrary>], iteration_bounds = array<i64: 1, 1, 1>, scalar_prefetch = 0 : i64, scratch_operands = 1 : i64, tpu.core_type = #tpu.core_type<tc>, window_params = [{transform_indices = @transform_0, window_bounds = array<i64: 16, 128>}, {transform_indices = @transform_1, window_bounds = array<i64: 128, 128>}, {transform_indices = @transform_2, window_bounds = array<i64: 16, 128>}, {transform_indices = @transform_3, window_bounds = array<i64: 16, 128>}]} {
    %c0_i32 = arith.constant 0 : i32
    %0 = arith.cmpi eq, %arg2, %c0_i32 : i32
    %1 = arith.extui %0 : i1 to i32
    %c0_i32_0 = arith.constant 0 : i32
    %2 = arith.cmpi ne, %1, %c0_i32_0 : i32
    scf.if %2 {
      %cst_10 = arith.constant 0.000000e+00 : f32
      %12 = vector.broadcast %cst_10 : f32 to vector<16x128xf32>
      %c0_11 = arith.constant 0 : index
      %c0_12 = arith.constant 0 : index
      %13 = vector.load %arg7[%c0_11, %c0_12] : memref<16x128xf32, #tpu.memory_space<vmem>>, vector<16x128xf32>
      tpu.vector_store %arg7[%c0_11, %c0_12], %12 {strides = array<i32>} : memref<16x128xf32, #tpu.memory_space<vmem>>, vector<16x128xf32>,
    } else {
    }
    %c0 = arith.constant 0 : index
    %c0_1 = arith.constant 0 : index
    %3 = vector.load %arg7[%c0, %c0_1] : memref<16x128xf32, #tpu.memory_space<vmem>>, vector<16x128xf32>
    %c0_2 = arith.constant 0 : index
    %c0_3 = arith.constant 0 : index
    %4 = vector.load %arg3[%c0_2, %c0_3] : memref<16x128xbf16, #tpu.memory_space<vmem>>, vector<16x128xbf16>
    %c0_4 = arith.constant 0 : index
    %c0_5 = arith.constant 0 : index
    %5 = vector.load %arg4[%c0_4, %c0_5] : memref<128x128xbf16, #tpu.memory_space<vmem>>, vector<128x128xbf16>
    %cst = arith.constant dense<0.000000e+00> : vector<16x128xf32>
    %6 = tpu.matmul %4, %5, %cst {dimension_numbers = #tpu.dot_dimension_numbers<[1], [0], [0], [1], [0, 0, 1, 1], [], []>} : vector<16x128xbf16>, vector<128x128xbf16>, vector<16x128xf32> -> vector<16x128xf32>
    %7 = arith.addf %3, %6 : vector<16x128xf32>
    %c0_6 = arith.constant 0 : index
    %c0_7 = arith.constant 0 : index
    %8 = vector.load %arg7[%c0_6, %c0_7] : memref<16x128xf32, #tpu.memory_space<vmem>>, vector<16x128xf32>
    tpu.vector_store %arg7[%c0_6, %c0_7], %7 {strides = array<i32>} : memref<16x128xf32, #tpu.memory_space<vmem>>, vector<16x128xf32>,
    %c0_i32_8 = arith.constant 0 : i32
    %9 = arith.cmpi eq, %arg2, %c0_i32_8 : i32
    %10 = arith.extui %9 : i1 to i32
    %c0_i32_9 = arith.constant 0 : i32
    %11 = arith.cmpi ne, %10, %c0_i32_9 : i32
    scf.if %11 {
      %c0_10 = arith.constant 0 : index
      %c0_11 = arith.constant 0 : index
      %12 = vector.load %arg7[%c0_10, %c0_11] : memref<16x128xf32, #tpu.memory_space<vmem>>, vector<16x128xf32>
      %c0_12 = arith.constant 0 : index
      %c0_13 = arith.constant 0 : index
      %13 = vector.load %arg5[%c0_12, %c0_13] : memref<16x128xbf16, #tpu.memory_space<vmem>>, vector<16x128xbf16>
      %14 = arith.extf %13 : vector<16x128xbf16> to vector<16x128xf32>
      %15 = arith.addf %12, %14 : vector<16x128xf32>
      %16 = arith.truncf %15 : vector<16x128xf32> to vector<16x128xbf16>
      %c0_14 = arith.constant 0 : index
      %c0_15 = arith.constant 0 : index
      %17 = vector.load %arg6[%c0_14, %c0_15] : memref<16x128xbf16, #tpu.memory_space<vmem>>, vector<16x128xbf16>
      tpu.vector_store %arg6[%c0_14, %c0_15], %16 {strides = array<i32>} : memref<16x128xbf16, #tpu.memory_space<vmem>>, vector<16x128xbf16>,
    } else {
    }
    return
  }
  func.func @transform_0(%arg0: i32, %arg1: i32, %arg2: i32) -> (i32, i32) {
    %c0_i32 = arith.constant 0 : i32
    return %arg0, %arg2 : i32, i32
  }
  func.func @transform_1(%arg0: i32, %arg1: i32, %arg2: i32) -> (i32, i32) {
    %c0_i32 = arith.constant 0 : i32
    return %arg2, %arg1 : i32, i32
  }
  func.func @transform_2(%arg0: i32, %arg1: i32, %arg2: i32) -> (i32, i32) {
    %c0_i32 = arith.constant 0 : i32
    return %arg0, %arg1 : i32, i32
  }
  func.func @transform_3(%arg0: i32, %arg1: i32, %arg2: i32) -> (i32, i32) {
    %c0_i32 = arith.constant 0 : i32
    return %arg0, %arg1 : i32, i32
  }
}

module attributes {stable_mosaic.version = 11 : i64} {
  func.func @_rmsnorm_swiglu_kernel(%arg0: i32, %arg1: i32, %arg2: memref<16x128xbf16, #tpu.memory_space<vmem>>, %arg3: memref<1x128xf32, #tpu.memory_space<vmem>>, %arg4: memref<128x256xbf16, #tpu.memory_space<vmem>>, %arg5: memref<128x256xbf16, #tpu.memory_space<vmem>>, %arg6: memref<16x256xbf16, #tpu.memory_space<vmem>>) attributes {dimension_semantics = [#tpu.dimension_semantics<parallel>, #tpu.dimension_semantics<parallel>], iteration_bounds = array<i64: 1, 1>, scalar_prefetch = 0 : i64, scratch_operands = 0 : i64, tpu.core_type = #tpu.core_type<tc>, window_params = [{transform_indices = @transform_0, window_bounds = array<i64: 16, 128>}, {pipeline_mode = #tpu.pipeline_mode<synchronous>, transform_indices = @transform_1, window_bounds = array<i64: 1, 128>}, {transform_indices = @transform_2, window_bounds = array<i64: 128, 256>}, {transform_indices = @transform_3, window_bounds = array<i64: 128, 256>}, {transform_indices = @transform_4, window_bounds = array<i64: 16, 256>}]} {
    %c0 = arith.constant 0 : index
    %c0_0 = arith.constant 0 : index
    %0 = vector.load %arg2[%c0, %c0_0] : memref<16x128xbf16, #tpu.memory_space<vmem>>, vector<16x128xbf16>
    %1 = arith.extf %0 : vector<16x128xbf16> to vector<16x128xf32>
    %2 = arith.mulf %1, %1 : vector<16x128xf32>
    %cst = arith.constant dense<0.000000e+00> : vector<16xf32>
    %3 = vector.multi_reduction <add>, %2, %cst [1] : vector<16x128xf32> to vector<16xf32>
    %4 = vector.shape_cast %3 : vector<16xf32> to vector<16x1xf32>
    %cst_1 = arith.constant 1.280000e+02 : f32
    %5 = vector.broadcast %cst_1 : f32 to vector<16x1xf32>
    %6 = arith.divf %4, %5 : vector<16x1xf32>
    %cst_2 = arith.constant 9.99999974E-6 : f32
    %7 = vector.broadcast %cst_2 : f32 to vector<16x1xf32>
    %8 = arith.addf %6, %7 : vector<16x1xf32>
    %9 = math.rsqrt %8 : vector<16x1xf32>
    %10 = vector.broadcast %9 : vector<16x1xf32> to vector<16x128xf32>
    %11 = arith.mulf %1, %10 : vector<16x128xf32>
    %c0_3 = arith.constant 0 : index
    %c0_4 = arith.constant 0 : index
    %12 = vector.load %arg3[%c0_3, %c0_4] : memref<1x128xf32, #tpu.memory_space<vmem>>, vector<1x128xf32>
    %13 = vector.broadcast %12 : vector<1x128xf32> to vector<16x128xf32>
    %14 = arith.mulf %11, %13 : vector<16x128xf32>
    %15 = arith.truncf %14 : vector<16x128xf32> to vector<16x128xbf16>
    %c0_5 = arith.constant 0 : index
    %c0_6 = arith.constant 0 : index
    %16 = vector.load %arg4[%c0_5, %c0_6] : memref<128x256xbf16, #tpu.memory_space<vmem>>, vector<128x256xbf16>
    %cst_7 = arith.constant dense<0.000000e+00> : vector<16x256xf32>
    %17 = tpu.matmul %15, %16, %cst_7 {dimension_numbers = #tpu.dot_dimension_numbers<[1], [0], [0], [1], [0, 0, 1, 1], [], []>} : vector<16x128xbf16>, vector<128x256xbf16>, vector<16x256xf32> -> vector<16x256xf32>
    %c0_8 = arith.constant 0 : index
    %c0_9 = arith.constant 0 : index
    %18 = vector.load %arg5[%c0_8, %c0_9] : memref<128x256xbf16, #tpu.memory_space<vmem>>, vector<128x256xbf16>
    %cst_10 = arith.constant dense<0.000000e+00> : vector<16x256xf32>
    %19 = tpu.matmul %15, %18, %cst_10 {dimension_numbers = #tpu.dot_dimension_numbers<[1], [0], [0], [1], [0, 0, 1, 1], [], []>} : vector<16x128xbf16>, vector<128x256xbf16>, vector<16x256xf32> -> vector<16x256xf32>
    %20 = arith.negf %17 : vector<16x256xf32>
    %21 = math.exp %20 : vector<16x256xf32>
    %cst_11 = arith.constant 1.000000e+00 : f32
    %22 = vector.broadcast %cst_11 : f32 to vector<16x256xf32>
    %23 = arith.addf %22, %21 : vector<16x256xf32>
    %24 = arith.divf %22, %23 : vector<16x256xf32>
    %25 = arith.mulf %17, %24 : vector<16x256xf32>
    %26 = arith.mulf %25, %19 : vector<16x256xf32>
    %27 = arith.truncf %26 : vector<16x256xf32> to vector<16x256xbf16>
    %c0_12 = arith.constant 0 : index
    %c0_13 = arith.constant 0 : index
    %28 = vector.load %arg6[%c0_12, %c0_13] : memref<16x256xbf16, #tpu.memory_space<vmem>>, vector<16x256xbf16>
    tpu.vector_store %arg6[%c0_12, %c0_13], %27 {strides = array<i32>} : memref<16x256xbf16, #tpu.memory_space<vmem>>, vector<16x256xbf16>,
    return
  }
  func.func @transform_0(%arg0: i32, %arg1: i32) -> (i32, i32) {
    %c0_i32 = arith.constant 0 : i32
    %c0_i32_0 = arith.constant 0 : i32
    return %arg0, %c0_i32 : i32, i32
  }
  func.func @transform_1(%arg0: i32, %arg1: i32) -> (i32, i32) {
    %c0_i32 = arith.constant 0 : i32
    %c0_i32_0 = arith.constant 0 : i32
    %c0_i32_1 = arith.constant 0 : i32
    return %c0_i32, %c0_i32_0 : i32, i32
  }
  func.func @transform_2(%arg0: i32, %arg1: i32) -> (i32, i32) {
    %c0_i32 = arith.constant 0 : i32
    %c0_i32_0 = arith.constant 0 : i32
    return %c0_i32, %arg1 : i32, i32
  }
  func.func @transform_3(%arg0: i32, %arg1: i32) -> (i32, i32) {
    %c0_i32 = arith.constant 0 : i32
    %c0_i32_0 = arith.constant 0 : i32
    return %c0_i32, %arg1 : i32, i32
  }
  func.func @transform_4(%arg0: i32, %arg1: i32) -> (i32, i32) {
    %c0_i32 = arith.constant 0 : i32
    return %arg0, %arg1 : i32, i32
  }
}

module attributes {stable_mosaic.version = 11 : i64} {
  func.func @_matmul_residual_kernel(%arg0: i32, %arg1: i32, %arg2: i32, %arg3: memref<16x256xbf16, #tpu.memory_space<vmem>>, %arg4: memref<256x128xbf16, #tpu.memory_space<vmem>>, %arg5: memref<16x128xbf16, #tpu.memory_space<vmem>>, %arg6: memref<16x128xbf16, #tpu.memory_space<vmem>>, %arg7: memref<16x128xf32, #tpu.memory_space<vmem>>) attributes {dimension_semantics = [#tpu.dimension_semantics<parallel>, #tpu.dimension_semantics<parallel>, #tpu.dimension_semantics<arbitrary>], iteration_bounds = array<i64: 1, 1, 1>, scalar_prefetch = 0 : i64, scratch_operands = 1 : i64, tpu.core_type = #tpu.core_type<tc>, window_params = [{transform_indices = @transform_0, window_bounds = array<i64: 16, 256>}, {transform_indices = @transform_1, window_bounds = array<i64: 256, 128>}, {transform_indices = @transform_2, window_bounds = array<i64: 16, 128>}, {transform_indices = @transform_3, window_bounds = array<i64: 16, 128>}]} {
    %c0_i32 = arith.constant 0 : i32
    %0 = arith.cmpi eq, %arg2, %c0_i32 : i32
    %1 = arith.extui %0 : i1 to i32
    %c0_i32_0 = arith.constant 0 : i32
    %2 = arith.cmpi ne, %1, %c0_i32_0 : i32
    scf.if %2 {
      %cst_10 = arith.constant 0.000000e+00 : f32
      %12 = vector.broadcast %cst_10 : f32 to vector<16x128xf32>
      %c0_11 = arith.constant 0 : index
      %c0_12 = arith.constant 0 : index
      %13 = vector.load %arg7[%c0_11, %c0_12] : memref<16x128xf32, #tpu.memory_space<vmem>>, vector<16x128xf32>
      tpu.vector_store %arg7[%c0_11, %c0_12], %12 {strides = array<i32>} : memref<16x128xf32, #tpu.memory_space<vmem>>, vector<16x128xf32>,
    } else {
    }
    %c0 = arith.constant 0 : index
    %c0_1 = arith.constant 0 : index
    %3 = vector.load %arg7[%c0, %c0_1] : memref<16x128xf32, #tpu.memory_space<vmem>>, vector<16x128xf32>
    %c0_2 = arith.constant 0 : index
    %c0_3 = arith.constant 0 : index
    %4 = vector.load %arg3[%c0_2, %c0_3] : memref<16x256xbf16, #tpu.memory_space<vmem>>, vector<16x256xbf16>
    %c0_4 = arith.constant 0 : index
    %c0_5 = arith.constant 0 : index
    %5 = vector.load %arg4[%c0_4, %c0_5] : memref<256x128xbf16, #tpu.memory_space<vmem>>, vector<256x128xbf16>
    %cst = arith.constant dense<0.000000e+00> : vector<16x128xf32>
    %6 = tpu.matmul %4, %5, %cst {dimension_numbers = #tpu.dot_dimension_numbers<[1], [0], [0], [1], [0, 0, 1, 1], [], []>} : vector<16x256xbf16>, vector<256x128xbf16>, vector<16x128xf32> -> vector<16x128xf32>
    %7 = arith.addf %3, %6 : vector<16x128xf32>
    %c0_6 = arith.constant 0 : index
    %c0_7 = arith.constant 0 : index
    %8 = vector.load %arg7[%c0_6, %c0_7] : memref<16x128xf32, #tpu.memory_space<vmem>>, vector<16x128xf32>
    tpu.vector_store %arg7[%c0_6, %c0_7], %7 {strides = array<i32>} : memref<16x128xf32, #tpu.memory_space<vmem>>, vector<16x128xf32>,
    %c0_i32_8 = arith.constant 0 : i32
    %9 = arith.cmpi eq, %arg2, %c0_i32_8 : i32
    %10 = arith.extui %9 : i1 to i32
    %c0_i32_9 = arith.constant 0 : i32
    %11 = arith.cmpi ne, %10, %c0_i32_9 : i32
    scf.if %11 {
      %c0_10 = arith.constant 0 : index
      %c0_11 = arith.constant 0 : index
      %12 = vector.load %arg7[%c0_10, %c0_11] : memref<16x128xf32, #tpu.memory_space<vmem>>, vector<16x128xf32>
      %c0_12 = arith.constant 0 : index
      %c0_13 = arith.constant 0 : index
      %13 = vector.load %arg5[%c0_12, %c0_13] : memref<16x128xbf16, #tpu.memory_space<vmem>>, vector<16x128xbf16>
      %14 = arith.extf %13 : vector<16x128xbf16> to vector<16x128xf32>
      %15 = arith.addf %12, %14 : vector<16x128xf32>
      %16 = arith.truncf %15 : vector<16x128xf32> to vector<16x128xbf16>
      %c0_14 = arith.constant 0 : index
      %c0_15 = arith.constant 0 : index
      %17 = vector.load %arg6[%c0_14, %c0_15] : memref<16x128xbf16, #tpu.memory_space<vmem>>, vector<16x128xbf16>
      tpu.vector_store %arg6[%c0_14, %c0_15], %16 {strides = array<i32>} : memref<16x128xbf16, #tpu.memory_space<vmem>>, vector<16x128xbf16>,
    } else {
    }
    return
  }
  func.func @transform_0(%arg0: i32, %arg1: i32, %arg2: i32) -> (i32, i32) {
    %c0_i32 = arith.constant 0 : i32
    return %arg0, %arg2 : i32, i32
  }
  func.func @transform_1(%arg0: i32, %arg1: i32, %arg2: i32) -> (i32, i32) {
    %c0_i32 = arith.constant 0 : i32
    return %arg2, %arg1 : i32, i32
  }
  func.func @transform_2(%arg0: i32, %arg1: i32, %arg2: i32) -> (i32, i32) {
    %c0_i32 = arith.constant 0 : i32
    return %arg0, %arg1 : i32, i32
  }
  func.func @transform_3(%arg0: i32, %arg1: i32, %arg2: i32) -> (i32, i32) {
    %c0_i32 = arith.constant 0 : i32
    return %arg0, %arg1 : i32, i32
  }
}

module attributes {stable_mosaic.version = 11 : i64} {
  func.func @_ce_kernel(%arg0: i32, %arg1: i32, %arg2: memref<16x128xbf16, #tpu.memory_space<vmem>>, %arg3: memref<16x1xi32, #tpu.memory_space<vmem>>, %arg4: memref<8x128xf32, #tpu.memory_space<vmem>>, %arg5: memref<16x1xf32, #tpu.memory_space<vmem>>, %arg6: memref<16x1xf32, #tpu.memory_space<vmem>>, %arg7: memref<16x1xf32, #tpu.memory_space<vmem>>, %arg8: memref<16x1xf32, #tpu.memory_space<vmem>>) attributes {dimension_semantics = [#tpu.dimension_semantics<arbitrary>, #tpu.dimension_semantics<arbitrary>], iteration_bounds = array<i64: 1, 2>, scalar_prefetch = 0 : i64, scratch_operands = 4 : i64, tpu.core_type = #tpu.core_type<tc>, window_params = [{transform_indices = @transform_0, window_bounds = array<i64: 16, 128>}, {transform_indices = @transform_1, window_bounds = array<i64: 16, 1>}, {pipeline_mode = #tpu.pipeline_mode<synchronous>, transform_indices = @transform_2, window_bounds = array<i64: 8, 128>}]} {
    %c0_i32 = arith.constant 0 : i32
    %0 = arith.cmpi eq, %arg0, %c0_i32 : i32
    %c0_i32_0 = arith.constant 0 : i32
    %1 = arith.cmpi eq, %arg1, %c0_i32_0 : i32
    %2 = arith.andi %0, %1 : i1
    %3 = arith.extui %2 : i1 to i32
    %c0_i32_1 = arith.constant 0 : i32
    %4 = arith.cmpi ne, %3, %c0_i32_1 : i32
    scf.if %4 {
      %cst_27 = arith.constant 0.000000e+00 : f32
      %55 = vector.broadcast %cst_27 : f32 to vector<8x128xf32>
      %c0_28 = arith.constant 0 : index
      %c0_29 = arith.constant 0 : index
      %56 = vector.load %arg4[%c0_28, %c0_29] : memref<8x128xf32, #tpu.memory_space<vmem>>, vector<8x128xf32>
      tpu.vector_store %arg4[%c0_28, %c0_29], %55 {strides = array<i32>} : memref<8x128xf32, #tpu.memory_space<vmem>>, vector<8x128xf32>,
    } else {
    }
    %c0_i32_2 = arith.constant 0 : i32
    %5 = arith.cmpi eq, %arg1, %c0_i32_2 : i32
    %6 = arith.extui %5 : i1 to i32
    %c0_i32_3 = arith.constant 0 : i32
    %7 = arith.cmpi ne, %6, %c0_i32_3 : i32
    scf.if %7 {
      %cst_27 = arith.constant -1.000000e+30 : f32
      %55 = vector.broadcast %cst_27 : f32 to vector<16x1xf32>
      %c0_28 = arith.constant 0 : index
      %c0_29 = arith.constant 0 : index
      %56 = vector.load %arg5[%c0_28, %c0_29] : memref<16x1xf32, #tpu.memory_space<vmem>>, vector<16x1xf32>
      tpu.vector_store %arg5[%c0_28, %c0_29], %55 {strides = array<i32>} : memref<16x1xf32, #tpu.memory_space<vmem>>, vector<16x1xf32>,
      %cst_30 = arith.constant 0.000000e+00 : f32
      %57 = vector.broadcast %cst_30 : f32 to vector<16x1xf32>
      %c0_31 = arith.constant 0 : index
      %c0_32 = arith.constant 0 : index
      %58 = vector.load %arg6[%c0_31, %c0_32] : memref<16x1xf32, #tpu.memory_space<vmem>>, vector<16x1xf32>
      tpu.vector_store %arg6[%c0_31, %c0_32], %57 {strides = array<i32>} : memref<16x1xf32, #tpu.memory_space<vmem>>, vector<16x1xf32>,
      %cst_33 = arith.constant 0.000000e+00 : f32
      %59 = vector.broadcast %cst_33 : f32 to vector<16x1xf32>
      %c0_34 = arith.constant 0 : index
      %c0_35 = arith.constant 0 : index
      %60 = vector.load %arg7[%c0_34, %c0_35] : memref<16x1xf32, #tpu.memory_space<vmem>>, vector<16x1xf32>
      tpu.vector_store %arg7[%c0_34, %c0_35], %59 {strides = array<i32>} : memref<16x1xf32, #tpu.memory_space<vmem>>, vector<16x1xf32>,
      %cst_36 = arith.constant 2.560000e+02 : f32
      %61 = vector.broadcast %cst_36 : f32 to vector<16x1xf32>
      %c0_37 = arith.constant 0 : index
      %c0_38 = arith.constant 0 : index
      %62 = vector.load %arg8[%c0_37, %c0_38] : memref<16x1xf32, #tpu.memory_space<vmem>>, vector<16x1xf32>
      tpu.vector_store %arg8[%c0_37, %c0_38], %61 {strides = array<i32>} : memref<16x1xf32, #tpu.memory_space<vmem>>, vector<16x1xf32>,
    } else {
    }
    %c0 = arith.constant 0 : index
    %c0_4 = arith.constant 0 : index
    %8 = vector.load %arg2[%c0, %c0_4] : memref<16x128xbf16, #tpu.memory_space<vmem>>, vector<16x128xbf16>
    %9 = arith.extf %8 : vector<16x128xbf16> to vector<16x128xf32>
    %c0_5 = arith.constant 0 : index
    %c0_6 = arith.constant 0 : index
    %10 = vector.load %arg3[%c0_5, %c0_6] : memref<16x1xi32, #tpu.memory_space<vmem>>, vector<16x1xi32>
    %11 = tpu.iota {dimensions = array<i32: 1>} : vector<16x128xi32>
    %c128_i32 = arith.constant 128 : i32
    %12 = arith.muli %arg1, %c128_i32 : i32
    %13 = vector.broadcast %12 : i32 to vector<16x128xi32>
    %14 = arith.addi %11, %13 : vector<16x128xi32>
    %cst = arith.constant dense<0xFF800000> : vector<16xf32>
    %15 = vector.multi_reduction <maximumf>, %9, %cst [1] : vector<16x128xf32> to vector<16xf32>
    %16 = vector.shape_cast %15 : vector<16xf32> to vector<16x1xf32>
    %c0_7 = arith.constant 0 : index
    %c0_8 = arith.constant 0 : index
    %17 = vector.load %arg5[%c0_7, %c0_8] : memref<16x1xf32, #tpu.memory_space<vmem>>, vector<16x1xf32>
    %18 = arith.maximumf %17, %16 : vector<16x1xf32>
    %c0_9 = arith.constant 0 : index
    %c0_10 = arith.constant 0 : index
    %19 = vector.load %arg6[%c0_9, %c0_10] : memref<16x1xf32, #tpu.memory_space<vmem>>, vector<16x1xf32>
    %20 = arith.subf %17, %18 : vector<16x1xf32>
    %21 = math.exp %20 : vector<16x1xf32>
    %22 = arith.mulf %19, %21 : vector<16x1xf32>
    %23 = vector.broadcast %18 : vector<16x1xf32> to vector<16x128xf32>
    %24 = arith.subf %9, %23 : vector<16x128xf32>
    %25 = math.exp %24 : vector<16x128xf32>
    %cst_11 = arith.constant dense<0.000000e+00> : vector<16xf32>
    %26 = vector.multi_reduction <add>, %25, %cst_11 [1] : vector<16x128xf32> to vector<16xf32>
    %27 = vector.shape_cast %26 : vector<16xf32> to vector<16x1xf32>
    %28 = arith.addf %22, %27 : vector<16x1xf32>
    %c0_12 = arith.constant 0 : index
    %c0_13 = arith.constant 0 : index
    %29 = vector.load %arg6[%c0_12, %c0_13] : memref<16x1xf32, #tpu.memory_space<vmem>>, vector<16x1xf32>
    tpu.vector_store %arg6[%c0_12, %c0_13], %28 {strides = array<i32>} : memref<16x1xf32, #tpu.memory_space<vmem>>, vector<16x1xf32>,
    %30 = vector.broadcast %10 : vector<16x1xi32> to vector<16x128xi32>
    %31 = arith.cmpi eq, %14, %30 : vector<16x128xi32>
    %32 = arith.extui %31 : vector<16x128xi1> to vector<16x128xi32>
    %33 = arith.sitofp %32 : vector<16x128xi32> to vector<16x128xf32>
    %c0_14 = arith.constant 0 : index
    %c0_15 = arith.constant 0 : index
    %34 = vector.load %arg7[%c0_14, %c0_15] : memref<16x1xf32, #tpu.memory_space<vmem>>, vector<16x1xf32>
    %35 = arith.mulf %9, %33 : vector<16x128xf32>
    %cst_16 = arith.constant dense<0.000000e+00> : vector<16xf32>
    %36 = vector.multi_reduction <add>, %35, %cst_16 [1] : vector<16x128xf32> to vector<16xf32>
    %37 = vector.shape_cast %36 : vector<16xf32> to vector<16x1xf32>
    %38 = arith.addf %34, %37 : vector<16x1xf32>
    %c0_17 = arith.constant 0 : index
    %c0_18 = arith.constant 0 : index
    %39 = vector.load %arg7[%c0_17, %c0_18] : memref<16x1xf32, #tpu.memory_space<vmem>>, vector<16x1xf32>
    tpu.vector_store %arg7[%c0_17, %c0_18], %38 {strides = array<i32>} : memref<16x1xf32, #tpu.memory_space<vmem>>, vector<16x1xf32>,
    %40 = vector.broadcast %16 : vector<16x1xf32> to vector<16x128xf32>
    %41 = arith.cmpf oeq, %9, %40 : vector<16x128xf32>
    %c256_i32 = arith.constant 256 : i32
    %42 = vector.broadcast %c256_i32 : i32 to vector<16x128xi32>
    %43 = arith.select %41, %14, %42 : vector<16x128xi1>, vector<16x128xi32>
    %cst_19 = arith.constant dense<2147483647> : vector<16xi32>
    %44 = vector.multi_reduction <minsi>, %43, %cst_19 [1] : vector<16x128xi32> to vector<16xi32>
    %45 = vector.shape_cast %44 : vector<16xi32> to vector<16x1xi32>
    %46 = arith.sitofp %45 : vector<16x1xi32> to vector<16x1xf32>
    %47 = arith.cmpf ogt, %16, %17 : vector<16x1xf32>
    %c0_20 = arith.constant 0 : index
    %c0_21 = arith.constant 0 : index
    %48 = vector.load %arg8[%c0_20, %c0_21] : memref<16x1xf32, #tpu.memory_space<vmem>>, vector<16x1xf32>
    %49 = arith.select %47, %46, %48 : vector<16x1xi1>, vector<16x1xf32>
    %c0_22 = arith.constant 0 : index
    %c0_23 = arith.constant 0 : index
    %50 = vector.load %arg8[%c0_22, %c0_23] : memref<16x1xf32, #tpu.memory_space<vmem>>, vector<16x1xf32>
    tpu.vector_store %arg8[%c0_22, %c0_23], %49 {strides = array<i32>} : memref<16x1xf32, #tpu.memory_space<vmem>>, vector<16x1xf32>,
    %c0_24 = arith.constant 0 : index
    %c0_25 = arith.constant 0 : index
    %51 = vector.load %arg5[%c0_24, %c0_25] : memref<16x1xf32, #tpu.memory_space<vmem>>, vector<16x1xf32>
    tpu.vector_store %arg5[%c0_24, %c0_25], %18 {strides = array<i32>} : memref<16x1xf32, #tpu.memory_space<vmem>>, vector<16x1xf32>,
    %c1_i32 = arith.constant 1 : i32
    %52 = arith.cmpi eq, %arg1, %c1_i32 : i32
    %53 = arith.extui %52 : i1 to i32
    %c0_i32_26 = arith.constant 0 : i32
    %54 = arith.cmpi ne, %53, %c0_i32_26 : i32
    scf.if %54 {
      %c0_i32_27 = arith.constant 0 : i32
      %55 = vector.broadcast %c0_i32_27 : i32 to vector<16x1xi32>
      %56 = arith.cmpi sge, %10, %55 : vector<16x1xi32>
      %57 = arith.extui %56 : vector<16x1xi1> to vector<16x1xi32>
      %58 = arith.sitofp %57 : vector<16x1xi32> to vector<16x1xf32>
      %c0_28 = arith.constant 0 : index
      %c0_29 = arith.constant 0 : index
      %59 = vector.load %arg5[%c0_28, %c0_29] : memref<16x1xf32, #tpu.memory_space<vmem>>, vector<16x1xf32>
      %c0_30 = arith.constant 0 : index
      %c0_31 = arith.constant 0 : index
      %60 = vector.load %arg6[%c0_30, %c0_31] : memref<16x1xf32, #tpu.memory_space<vmem>>, vector<16x1xf32>
      %61 = math.log %60 : vector<16x1xf32>
      %62 = arith.addf %59, %61 : vector<16x1xf32>
      %c0_32 = arith.constant 0 : index
      %c0_33 = arith.constant 0 : index
      %63 = vector.load %arg7[%c0_32, %c0_33] : memref<16x1xf32, #tpu.memory_space<vmem>>, vector<16x1xf32>
      %64 = arith.subf %62, %63 : vector<16x1xf32>
      %65 = arith.mulf %64, %58 : vector<16x1xf32>
      %c0_34 = arith.constant 0 : index
      %c0_35 = arith.constant 0 : index
      %66 = vector.load %arg8[%c0_34, %c0_35] : memref<16x1xf32, #tpu.memory_space<vmem>>, vector<16x1xf32>
      %67 = arith.sitofp %10 : vector<16x1xi32> to vector<16x1xf32>
      %68 = arith.cmpf oeq, %66, %67 : vector<16x1xf32>
      %69 = arith.extui %68 : vector<16x1xi1> to vector<16x1xi32>
      %70 = arith.sitofp %69 : vector<16x1xi32> to vector<16x1xf32>
      %71 = arith.mulf %70, %58 : vector<16x1xf32>
      %72 = vector.shape_cast %65 : vector<16x1xf32> to vector<1x16x1xf32>
      %cst_36 = arith.constant dense<0.000000e+00> : vector<1xf32>
      %73 = vector.multi_reduction <add>, %72, %cst_36 [1, 2] : vector<1x16x1xf32> to vector<1xf32>
      %74 = vector.shape_cast %73 : vector<1xf32> to vector<1x1x1xf32>
      %75 = vector.extract %74[0, 0, 0] : f32 from vector<1x1x1xf32>
      %76 = vector.shape_cast %71 : vector<16x1xf32> to vector<1x16x1xf32>
      %cst_37 = arith.constant dense<0.000000e+00> : vector<1xf32>
      %77 = vector.multi_reduction <add>, %76, %cst_37 [1, 2] : vector<1x16x1xf32> to vector<1xf32>
      %78 = vector.shape_cast %77 : vector<1xf32> to vector<1x1x1xf32>
      %79 = vector.extract %78[0, 0, 0] : f32 from vector<1x1x1xf32>
      %80 = vector.shape_cast %58 : vector<16x1xf32> to vector<1x16x1xf32>
      %cst_38 = arith.constant dense<0.000000e+00> : vector<1xf32>
      %81 = vector.multi_reduction <add>, %80, %cst_38 [1, 2] : vector<1x16x1xf32> to vector<1xf32>
      %82 = vector.shape_cast %81 : vector<1xf32> to vector<1x1x1xf32>
      %83 = vector.extract %82[0, 0, 0] : f32 from vector<1x1x1xf32>
      %84 = tpu.iota {dimensions = array<i32: 0>} : vector<8x128xi32>
      %c0_i32_39 = arith.constant 0 : i32
      %85 = vector.broadcast %c0_i32_39 : i32 to vector<8x128xi32>
      %86 = arith.cmpi eq, %84, %85 : vector<8x128xi32>
      %c1_i32_40 = arith.constant 1 : i32
      %87 = vector.broadcast %c1_i32_40 : i32 to vector<8x128xi32>
      %88 = arith.cmpi eq, %84, %87 : vector<8x128xi32>
      %c2_i32 = arith.constant 2 : i32
      %89 = vector.broadcast %c2_i32 : i32 to vector<8x128xi32>
      %90 = arith.cmpi eq, %84, %89 : vector<8x128xi32>
      %cst_41 = arith.constant 0.000000e+00 : f32
      %91 = vector.broadcast %83 : f32 to vector<8x128xf32>
      %92 = vector.broadcast %cst_41 : f32 to vector<8x128xf32>
      %93 = arith.select %90, %91, %92 : vector<8x128xi1>, vector<8x128xf32>
      %94 = vector.broadcast %79 : f32 to vector<8x128xf32>
      %95 = arith.select %88, %94, %93 : vector<8x128xi1>, vector<8x128xf32>
      %96 = vector.broadcast %75 : f32 to vector<8x128xf32>
      %97 = arith.select %86, %96, %95 : vector<8x128xi1>, vector<8x128xf32>
      %c0_42 = arith.constant 0 : index
      %c0_43 = arith.constant 0 : index
      %98 = vector.load %arg4[%c0_42, %c0_43] : memref<8x128xf32, #tpu.memory_space<vmem>>, vector<8x128xf32>
      %99 = arith.addf %98, %97 : vector<8x128xf32>
      %c0_44 = arith.constant 0 : index
      %c0_45 = arith.constant 0 : index
      %100 = vector.load %arg4[%c0_44, %c0_45] : memref<8x128xf32, #tpu.memory_space<vmem>>, vector<8x128xf32>
      tpu.vector_store %arg4[%c0_44, %c0_45], %99 {strides = array<i32>} : memref<8x128xf32, #tpu.memory_space<vmem>>, vector<8x128xf32>,
    } else {
    }
    return
  }
  func.func @transform_0(%arg0: i32, %arg1: i32) -> (i32, i32) {
    %c0_i32 = arith.constant 0 : i32
    return %arg0, %arg1 : i32, i32
  }
  func.func @transform_1(%arg0: i32, %arg1: i32) -> (i32, i32) {
    %c0_i32 = arith.constant 0 : i32
    %c0_i32_0 = arith.constant 0 : i32
    return %arg0, %c0_i32 : i32, i32
  }
  func.func @transform_2(%arg0: i32, %arg1: i32) -> (i32, i32) {
    %c0_i32 = arith.constant 0 : i32
    %c0_i32_0 = arith.constant 0 : i32
    %c0_i32_1 = arith.constant 0 : i32
    return %c0_i32, %c0_i32_0 : i32, i32
  }
}

</mosaic_0001>

<bundles_post_ra>
// kernel: _lambda_.12
= control target key start
LH: loop header
LB: loop body
LE: loop exit
PB: predicated region body
PF: predicated region fallthrough
CT: control target
= control target key end

     0   :  { %v288_v10 = vmov 128.0   ;;  %s427_s0 = inlined_call_operand.vmem [shape: bf16[16,128], index: 0, kind: input, shape index: {}]   ;;  %s428_s1 = inlined_call_operand.vmem [shape: f32[1,128], index: 1, kind: input, shape index: {}]   ;;  %s429_s2 = inlined_call_operand.vmem [shape: bf16[128,256], index: 2, kind: input, shape index: {}]   ;;  %s430_s3 = inlined_call_operand.vmem [shape: bf16[16,256], index: 3, kind: output, shape index: {}]  }
   0x1   :  { %v277_v0 = vld [vmem:[%s427_s0] sm:$0xff]   ;;  %v254_v5 = vld [vmem:[%s429_s2 + $0x70] sm:$0xf]  ;;  %v275_v6 = vld [vmem:[%s429_s2 + $0x74] sm:$0xf0]  ;;  %282 = vrcp.f32 %v288_v10 }
   0x2   :  { %v312_v1 = vunpack.c.l.bf16 %v277_v0  ;;  %v316_v3 = vunpack.c.h.bf16 %v277_v0  ;;  %v274_v7 = vld [vmem:[%s429_s2 + $0x74] sm:$0xf]  ;;  %v255_v8 = vor.u32 %v275_v6, %v254_v5  ;;  %v256_v9 = vld [vmem:[%s429_s2 + $0x78] sm:$0xf0]  ;;  %v246_v12 = vld [vmem:[%s429_s2 + $0x60] sm:$0xf] }
   0x3   :  { %v259_v11 = vor.u32 %v274_v7, %v256_v9  ;;  %v273_v13 = vld [vmem:[%s429_s2 + $0x64] sm:$0xf0]  ;;  %v272_v14 = vld [vmem:[%s429_s2 + $0x64] sm:$0xf]  ;;  %v248_v16 = vld [vmem:[%s429_s2 + $0x68] sm:$0xf0] }
   0x4   :  { %v18_v2 = vmul.f32 %v312_v1, %v312_v1  ;;  %v19_v4 = vmul.f32 %v316_v3, %v316_v3  ;;  %160 = vmatpush.bf16.msra.mxu0 %v255_v8  ;;  %v247_v15 = vor.u32 %v273_v13, %v246_v12  ;;  %v251_v17 = vor.u32 %v272_v14, %v248_v16  ;;  %v238_v19 = vld [vmem:[%s429_s2 + $0x50] sm:$0xf]  ;;  %v271_v20 = vld [vmem:[%s429_s2 + $0x54] sm:$0xf0]  ;;  %v270_v21 = vld [vmem:[%s429_s2 + $0x54] sm:$0xf] }
   0x5   :  { %174 = vmatpush.bf16.msra.mxu1 %v259_v11  ;;  %v239_v22 = vor.u32 %v271_v20, %v238_v19  ;;  %v240_v23 = vld [vmem:[%s429_s2 + $0x58] sm:$0xf0]  ;;  %v230_v26 = vld [vmem:[%s429_s2 + $0x40] sm:$0xf]  ;;  %v269_v27 = vld [vmem:[%s429_s2 + $0x44] sm:$0xf0] }
   0x6   :  { %20 = vadd.xlane.f32.xlu0 %v18_v2  ;;  %v243_v24 = vor.u32 %v270_v21, %v240_v23  ;;  %v268_v28 = vld [vmem:[%s429_s2 + $0x44] sm:$0xf]  ;;  %v231_v29 = vor.u32 %v269_v27, %v230_v26  ;;  %v232_v30 = vld [vmem:[%s429_s2 + $0x48] sm:$0xf0]  ;;  %v222_v33 = vld [vmem:[%s429_s2 + $0x30] sm:$0xf] }
   0x7   :  { %v283_v18 = vpop.eup %282  ;;  %v235_v31 = vor.u32 %v268_v28, %v232_v30  ;;  %v267_v34 = vld [vmem:[%s429_s2 + $0x34] sm:$0xf0]  ;;  %v266_v35 = vld [vmem:[%s429_s2 + $0x34] sm:$0xf]  ;;  %v224_v37 = vld [vmem:[%s429_s2 + $0x38] sm:$0xf0] }
   0x8   :  { %161 = vmatpush.bf16.msra.mxu0 %v247_v15  ;;  %v25_v25 = vmul.f32 128.0, %v283_v18  ;;  %v223_v36 = vor.u32 %v267_v34, %v222_v33  ;;  %v227_v38 = vor.u32 %v266_v35, %v224_v37  ;;  %v214_v40 = vld [vmem:[%s429_s2 + $0x20] sm:$0xf]  ;;  %v265_v41 = vld [vmem:[%s429_s2 + $0x24] sm:$0xf0]  ;;  %vm29_vm0 = vweird.f32 %v283_v18 }
   0x9   :  { %175 = vmatpush.bf16.msra.mxu1 %v251_v17  ;;  %v264_v42 = vld [vmem:[%s429_s2 + $0x24] sm:$0xf]  ;;  %v215_v43 = vor.u32 %v265_v41, %v214_v40  ;;  %v216_v44 = vld [vmem:[%s429_s2 + $0x28] sm:$0xf0]  ;;  %v206_v47 = vld [vmem:[%s429_s2 + $0x10] sm:$0xf] }
   0xa   :  { %v26_v32 = vsub.f32 1.0, %v25_v25  ;;  %v219_v45 = vor.u32 %v264_v42, %v216_v44  ;;  %v263_v48 = vld [vmem:[%s429_s2 + $0x14] sm:$0xf0]  ;;  %v262_v49 = vld [vmem:[%s429_s2 + $0x14] sm:$0xf] }
   0xb   :  { %v207_v50 = vor.u32 %v263_v48, %v206_v47  ;;  %v208_v51 = vld [vmem:[%s429_s2 + $0x18] sm:$0xf0]  ;;  %v198_v52 = vld [vmem:[%s429_s2] sm:$0xf]  ;;  %v261_v53 = vld [vmem:[%s429_s2 + $0x4] sm:$0xf0] }
   0xc   :  { %162 = vmatpush.bf16.msra.mxu0 %v239_v22  ;;  %v27_v39 = vmul.f32 %v283_v18, %v26_v32  ;;  %v211_v54 = vor.u32 %v262_v49, %v208_v51  ;;  %v260_v55 = vld [vmem:[%s429_s2 + $0x4] sm:$0xf]  ;;  %v200_v56 = vld [vmem:[%s429_s2 + $0x8] sm:$0xf0]  ;;  %v199_v58 = vor.u32 %v261_v53, %v198_v52 }
   0xd   :  { %176 = vmatpush.bf16.msra.mxu1 %v243_v24  ;;  %v203_v59 = vor.u32 %v260_v55, %v200_v56 }
   0xe   :  { %22 = vadd.xlane.f32.xlu0 %v19_v4  ;;  %v28_v46 = vadd.f32 %v283_v18, %v27_v39 }
  0x10   :  { %163 = vmatpush.bf16.msra.mxu0 %v231_v29  ;;  %v30_v57 = vsel %vm29_vm0, %v283_v18, %v28_v46  ;;  %v281_v18 = vld [vmem:[%s428_s1] ss:$0 sm:$0xff] }
  0x11   :  { %177 = vmatpush.bf16.msra.mxu1 %v235_v31 }
  0x14   :  { %164 = vmatpush.bf16.msra.mxu0 %v223_v36 }
  0x15   :  { %178 = vmatpush.bf16.msra.mxu1 %v227_v38 }
  0x18   :  { %165 = vmatpush.bf16.msra.mxu0 %v215_v43 }
  0x19   :  { %179 = vmatpush.bf16.msra.mxu1 %v219_v45 }
  0x1c   :  { %166 = vmatpush.bf16.msra.mxu0 %v207_v50 }
  0x1d   :  { %180 = vmatpush.bf16.msra.mxu1 %v211_v54 }
  0x20   :  { %167 = vmatpush.bf16.msra.mxu0 %v199_v58 }
  0x21   :  { %181 = vmatpush.bf16.msra.mxu1 %v203_v59 }
  0x79   :  { %v21_v60 = vpop.xlane.xlu0 %20 }
  0x7a   :  { %v31_v61 = vmul.f32 %v30_v57, %v21_v60 }
  0x7c   :  { %v33_v62 = vadd.f32 1e-05, %v31_v61 }
  0x7e   :  { %284 = vrsqrt.f32 %v33_v62  ;;  %vm41_vm2 = vweird.f32 %v33_v62 }
  0x81   :  { %v23_v63 = vpop.xlane.xlu0 %22 }
  0x82   :  { %v32_v0 = vmul.f32 %v30_v57, %v23_v63 }
  0x84   :  { %v285_v2 = vpop.eup %284  ;;  %v34_v4 = vadd.f32 1e-05, %v32_v0 }
  0x85   :  { %v36_v5 = vmul.f32 %v285_v2, %v33_v62  ;;  %vm42_vm1 = vweird.f32 %v285_v2 }
  0x86   :  { %286 = vrsqrt.f32 %v34_v4  ;;  %vm43_vm3 = vmor %vm41_vm2, %vm42_vm1  ;;  %vm51_vm5 = vweird.f32 %v34_v4 }
  0x87   :  { %v37_v6 = vmul.f32 %v285_v2, %v36_v5 }
  0x89   :  { %v38_v7 = vmul.f32 0.5, %v37_v6 }
  0x8b   :  { %v39_v8 = vsub.f32 1.5, %v38_v7 }
  0x8c   :  { %v287_v9 = vpop.eup %286 }
  0x8d   :  { %v46_v10 = vmul.f32 %v287_v9, %v34_v4  ;;  %v40_v11 = vmul.f32 %v285_v2, %v39_v8  ;;  %vm52_vm4 = vweird.f32 %v287_v9 }
  0x8e   :  { %vm53_vm6 = vmor %vm51_vm5, %vm52_vm4 }
  0x8f   :  { %v47_v12 = vmul.f32 %v287_v9, %v46_v10  ;;  %v44_v15 = vsel %vm43_vm3, %v285_v2, %v40_v11 }
  0x90   :  { %v55_v17 = vmul.f32 %v312_v1, %v44_v15 }
  0x91   :  { %v48_v13 = vmul.f32 0.5, %v47_v12 }
  0x92   :  { %v61_v21 = vmul.f32 %v281_v18, %v55_v17 }
  0x93   :  { %v49_v14 = vsub.f32 1.5, %v48_v13 }
  0x95   :  { %v50_v16 = vmul.f32 %v287_v9, %v49_v14 }
  0x97   :  { %v54_v19 = vsel %vm53_vm6, %v287_v9, %v50_v16 }
  0x98   :  { %v56_v20 = vmul.f32 %v316_v3, %v54_v19 }
  0x9a   :  { %v62_v22 = vmul.f32 %v281_v18, %v56_v20 }
  0x9c   :  { %v63_v23 = vpack.c.bf16 %v62_v22, %v61_v21 }
  0x9e   :  { %168 = vmatmul.bf16.vlgmr.msra.gmra.mxu0 %v63_v23  ;;  %182 = vmatmul.bf16.vlgmr.msra.gmra.mxu1 %v63_v23 }
 0x11b   :  { %v169_v24 = vpop.f32.mrf.mxu0  ;;  %v183_v25 = vpop.f32.mrf.mxu1 }
 0x11c   :  { %v188_v26 = vpack.c.bf16 %v183_v25, %v169_v24 }
 0x11e   :  { %190 = vst [vmem:[%s430_s3] sm:$0xff] %v188_v26 }
 0x123   :  { %v171_v1 = vpop.f32.mrf.mxu0  ;;  %v185_v27 = vpop.f32.mrf.mxu1 }
 0x124   :  { %v189_v28 = vpack.c.bf16 %v185_v27, %v171_v1 }
 0x126   :  { %191 = vst [vmem:[%s430_s3 + $0x8] sm:$0xff] %v189_v28 }

// kernel: _lambda_.14
= control target key start
LH: loop header
LB: loop body
LE: loop exit
PB: predicated region body
PF: predicated region fallthrough
CT: control target
= control target key end

     0   :  { %s238_s1 = inlined_call_operand.vmem [shape: bf16[128,128], index: 1, kind: input, shape index: {}]   ;;  %s239_s0 = inlined_call_operand.vmem [shape: bf16[16,128], index: 0, kind: input, shape index: {}]   ;;  %s240_s2 = inlined_call_operand.vmem [shape: bf16[16,128], index: 2, kind: input, shape index: {}]   ;;  %s241_s3 = inlined_call_operand.vmem [shape: bf16[16,128], index: 3, kind: output, shape index: {}]  }
   0x1   :  { %v175_v0 = vld [vmem:[%s238_s1 + $0x38] sm:$0xff]  ;;  %v174_v1 = vld [vmem:[%s238_s1 + $0x30] sm:$0xff]  ;;  %v173_v2 = vld [vmem:[%s238_s1 + $0x28] sm:$0xff] }
   0x2   :  { %94 = vmatpush.bf16.msra.mxu0 %v175_v0  ;;  %v172_v3 = vld [vmem:[%s238_s1 + $0x20] sm:$0xff]  ;;  %v171_v4 = vld [vmem:[%s238_s1 + $0x18] sm:$0xff]  ;;  %v170_v5 = vld [vmem:[%s238_s1 + $0x10] sm:$0xff] }
   0x3   :  { %v169_v6 = vld [vmem:[%s238_s1 + $0x8] sm:$0xff]  ;;  %v168_v7 = vld [vmem:[%s238_s1] sm:$0xff] }
   0x4   :  { %v167_v8 = vld [vmem:[%s239_s0] sm:$0xff] }
   0x5   :  { %v177_v10 = vld [vmem:[%s240_s2] sm:$0xff]  }
   0x6   :  { %95 = vmatpush.bf16.msra.mxu0 %v174_v1  ;;  %v178_v11 = vunpack.c.l.bf16 %v177_v10  ;;  %v179_v12 = vunpack.c.h.bf16 %v177_v10 }
   0xa   :  { %96 = vmatpush.bf16.msra.mxu0 %v173_v2 }
   0xe   :  { %97 = vmatpush.bf16.msra.mxu0 %v172_v3 }
  0x12   :  { %98 = vmatpush.bf16.msra.mxu0 %v171_v4 }
  0x16   :  { %99 = vmatpush.bf16.msra.mxu0 %v170_v5 }
  0x1a   :  { %100 = vmatpush.bf16.msra.mxu0 %v169_v6 }
  0x1e   :  { %101 = vmatpush.bf16.msra.mxu0 %v168_v7 }
  0x21   :  { %102 = vmatmul.bf16.vlgmr.msra.gmra.mxu0 %v167_v8 }
  0x9e   :  { %v103_v9 = vpop.f32.mrf.mxu0 }
  0x9f   :  { %v121_v14 = vadd.f32 %v178_v11, %v103_v9 }
  0xa6   :  { %v105_v13 = vpop.f32.mrf.mxu0 }
  0xa7   :  { %v122_v15 = vadd.f32 %v179_v12, %v105_v13 }
  0xa9   :  { %v183_v16 = vpack.c.bf16 %v122_v15, %v121_v14 }
  0xab   :  { %184 = vst [vmem:[%s241_s3] sm:$0xff] %v183_v16  }

// kernel: _lambda_.13
= control target key start
LH: loop header
LB: loop body
LE: loop exit
PB: predicated region body
PF: predicated region fallthrough
CT: control target
= control target key end

     0   :  { %s777_s12 = smov 0   ;;  %s779_s13 = smov 0   ;;  %s861_s0 = inlined_call_operand.vmem [shape: bf16[2,2,8,64], index: 0, kind: input, shape index: {}]   ;;  %s862_s1 = inlined_call_operand.vmem [shape: bf16[2,2,8,32], index: 1, kind: input, shape index: {}]   ;;  %s863_s2 = inlined_call_operand.vmem [shape: bf16[2,2,8,32], index: 2, kind: input, shape index: {}]   ;;  %s864_s3 = inlined_call_operand.vmem [shape: bf16[2,2,8,64], index: 3, kind: output, shape index: {}]  }
   0x1   :  { %s781_s14 = smov 0   ;;  %s783_s15 = smov 0  }
   0x2   :  { %s785_s16 = smov 0  }
   0x3 LB: > { %s28_s17 = sadd.s32 1, %s742_s14  ;;  %s32_s18 = sadd.s32 1, %s746_s15  ;;  %s750_s16 = sphi %s785_s16, %s13_s16   ;;  %s746_s15 = sphi %s783_s15, %s868_s15   ;;  %s742_s14 = sphi %s781_s14, %s867_s14   ;;  %s738_s13 = sphi %s779_s13, %s866_s13   ;;  %s734_s12 = sphi %s777_s12, %s865_s12  }
   0x4   : > { %p30_p0 = scmp.ge.s32.totalorder %s28_s17, 2  ;;  %p637_p1 = scmp.ge.s32.totalorder %s750_s16, 1 }
   0x5   : > { %p203_p2 = scmp.lt.s32.totalorder %s750_s16, 5 }
   0x6   : > { %s870_s17 = smov (%p30_p0, %s28_s17), 0  ;;  %s872_s18 = smov (!%p30_p0, %s32_s18), %s746_s15 }
   0x7   : > { %p204_p3 = pnand %p637_p1, %p203_p2  ;;  %p34_p4 = scmp.ge.s32.totalorder %s872_s18, 2 }
   0x8   : > { %p255_p5 = scmp.lt.s32.totalorder (!%p204_p3), %s738_s13, 1  ;;  %p257_p6 = scmp.lt.s32.totalorder (!%p204_p3), %s734_s12, 1 }
   0x9   : > { %s874_s18 = smov (%p34_p4, %s872_s18), 0  ;;  %207 = sbr.rel (%p204_p3) target bundleno = 778 (0x30a), region = 32 }
   0xa   : > { %s752_s28 = smov (!%p204_p3), 96   ;;  %s756_s5 = smov (!%p204_p3), 32  }
   0xe   : > { %s876_s13 = smov (!%p255_p5, %s738_s13), 1  ;;  %s878_s12 = smov (!%p257_p6, %s734_s12), 1  ;;  %vm316_vm0 = vcmask 261120   ;;  %v307_v7 = vlaneseq  ;;  %vm339_vm2 = vcmask 64512   ;;  %vm298_vm3 = vcmask 7168  }
   0xf   : > { %s638_s19 = sshll.u32 %s876_s13, 1  ;;  %v753_v15 = vmov -1e+30   ;;  %v754_v16 = vmov 0   ;;  %vm374_vm4 = vcmask 1043456   ;;  %v755_v28 = vmov 0.0  }
  0x10   : > { %s260_s20 = sadd.s32 %s638_s19, %s878_s12  ;;  %v308_v8 = vshrl.u32 %v307_v7, 7  ;;  %v310_v9 = vand.u32 127, %v307_v7  ;;  %299 = vst.msk [vmem:[#allocation2] sm:$0xff] %vm298_vm3, %v753_v15  ;;  %698 = vset.pattern.permute.xlu2 %v754_v16  ;;  %697 = vset.pattern.permute.xlu1 %v754_v16  ;;  %vm303_vm5 = vcmask 523264   ;;  %vm472_vm6 = vcmask 523520  }
  0x11   : > { %s807_s21 = sshll.u32 %s260_s20, 2  ;;  %300 = vst.msk [vmem:[#allocation2 + $0x8] sm:$0xff] %vm298_vm3, %v753_v15  ;;  %699 = vset.pattern.permute.xlu0 %v754_v16  ;;  %vm500_vm7 = vcmask 519168  }
  0x12   : > { %s273_s24 = scalar_lea.vmem %s862_s1, %s807_s21  ;;  %s262_s27 = scalar_lea.vmem %s861_s0, %s807_s21  ;;  %vm314_vm1 = vcmp.ge.s32.totalorder %v308_v8, %v310_v9  ;;  %301 = vst.msk [vmem:[#allocation3] sm:$0xff] %vm298_vm3, %v755_v28 }
  0x13   : > { %v305_v0 = vld [vmem:[%s273_s24] sm:$0xf]  ;;  %s284_s4 = scalar_lea.vmem %s863_s2, %s807_s21  ;;  %302 = vst.msk [vmem:[#allocation3 + $0x8] sm:$0xff] %vm298_vm3, %v755_v28  ;;  %s292_s8 = scalar_lea.vmem %s864_s3, %s807_s21 }
  0x14   : > { %v321_v1 = vsel %vm316_vm0, %v305_v0, 0  ;;  %v394_v2 = vld [vmem:[%s262_s27] sm:$0xf]  ;;  %304 = vst.msk [vmem:[#allocation4] sm:$0xff] %vm303_vm5, %v755_v28 }
  0x15   : > { %330 = vmatpush.bf16.xpose.msra.mxu0 %v321_v1  ;;  %v396_v3 = vunpack.c.l.b16 %v394_v2  ;;  %410 = vmatpush.bf16.xpose.msra.mxu2 %v321_v1  ;;  %v315_v5 = vld [vmem:[%s262_s27] sm:$0xf] }
  0x16   : > { %v306_v26 = vld [vmem:[%s284_s4] sm:$0xf] }
  0x17   : > { %v397_v4 = vpack.c.b16 %v396_v3, %v396_v3  ;;  %v338_v18 = vld [vmem:[#allocation2] sm:$0xff]  ;;  %v376_v27 = vsel %vm374_vm4, %v306_v26, 0 }
  0x18   : > { %385 = vmatpush.bf16.msra.mxu1 %v376_v27  ;;  %461 = vmatpush.bf16.msra.mxu3 %v376_v27  ;;  %v419_v35 = vld [vmem:[#allocation2 + $0x8] sm:$0xff] }
  0x19   : > { %398 = vrot.lane.b32.xlu0 %v397_v4, %s752_s28  ;;  %v355_v43 = vld [vmem:[#allocation3] sm:$0xff] }
  0x1a   : > { %v436_v61 = vld [vmem:[#allocation3 + $0x8] sm:$0xff] }
  0x1b   : > { %v363_v47 = vld [vmem:[#allocation4] sm:$0xff] }
  0x1c   : > { %646 = vmatmul.msk.bf16.vlgmr.msra.gmra.mxu0 %vm316_vm0, %v315_v5 }
  0x8b   : > { %v399_v6 = vpop.permute.xlu0 %398 }
  0x8c   : > { %648 = vmatmul.msk.bf16.vlgmr.msra.gmra.mxu2 %vm316_vm0, %v399_v6 }
  0x99   : > { %v332_v10 = vpop.f32.mrf.mxu0 }
  0x9a   : > { %v336_v11 = vmul.f32 0.17677669, %v332_v10 }
  0x9c   : > { %v337_v12 = vsel %vm314_vm1, %v336_v11, -1e+30 }
  0x9d   : > { %v340_v13 = vsel %vm339_vm2, %v337_v12, -inf }
  0x9e   : > { %341 = vmax.xlane.f32.xlu1 %v340_v13 }
  0xa1   : > { %v334_v14 = vpop.f32.mrf.mxu0 }
 0x10f   : > { %v412_v17 = vpop.f32.mrf.mxu2 }
 0x110   : > { %v416_v19 = vmul.f32 0.17677669, %v412_v17 }
 0x111   : > { %v342_v20 = vpop.xlane.xlu1 %341 }
 0x112   : > { %v343_v21 = vmax.f32 %v338_v18, %v342_v20  ;;  %v417_v22 = vsel %vm314_vm1, %v416_v19, -1e+30 }
 0x113   : > { %v420_v23 = vsel %vm339_vm2, %v417_v22, -inf }
 0x114   : > { %v344_v24 = vsub.f32 %v338_v18, %v343_v21  ;;  %393 = vst.msk [vmem:[#allocation2] sm:$0xff] %vm298_vm3, %v343_v21  ;;  %421 = vmax.xlane.f32.xlu0 %v420_v23  ;;  %349 = vperm.xlu2 %698, %v343_v21  }
 0x116   : > { %v345_v36 = vmul.f32 1.442695, %v344_v24 }
 0x117   : > { %v414_v25 = vpop.f32.mrf.mxu2 }
 0x16e   : > { %v350_v29 = vpop.permute.xlu2 %349 }
 0x16f   : > { %v352_v30 = vsub.f32 %v337_v12, %v350_v29 }
 0x171   : > { %v353_v31 = vmul.f32 1.442695, %v352_v30 }
 0x173   : > { %700 = vpow2.f32 %v353_v31 }
 0x174   : > { %702 = vpow2.f32 %v345_v36 }
 0x179   : > { %v701_v32 = vpop.eup %700 }
 0x17a   : > { %v357_v33 = vsel %vm339_vm2, %v701_v32, 0.0  ;;  %v370_v34 = vpack.c.bf16 %v701_v32, %v701_v32  ;;  %v703_v41 = vpop.eup %702 }
 0x17b   : > { %358 = vadd.xlane.f32.xlu2 %v357_v33  ;;  %v356_v44 = vmul.f32 %v703_v41, %v355_v43 }
 0x17c   : > { %647 = vmatmul.msk.bf16.vlgmr.msra.gmra.mxu1 %vm339_vm2, %v370_v34 }
 0x187   : > { %v422_v37 = vpop.xlane.xlu0 %421 }
 0x188   : > { %v423_v38 = vmax.f32 %v419_v35, %v422_v37 }
 0x18a   : > { %v424_v39 = vsub.f32 %v419_v35, %v423_v38  ;;  %474 = vst.msk [vmem:[#allocation2 + $0x8] sm:$0xff] %vm298_vm3, %v423_v38  ;;  %429 = vperm.xlu1 %697, %v423_v38  }
 0x18c   : > { %v425_v40 = vmul.f32 1.442695, %v424_v39 }
 0x18e   : > { %704 = vpow2.f32 %v425_v40 }
 0x193   : > { %366 = vperm.xlu2 %698, %v703_v41  }
 0x194   : > { %v705_v42 = vpop.eup %704 }
 0x195   : > { %446 = vperm.xlu0 %699, %v705_v42   ;;  %v437_v62 = vmul.f32 %v705_v42, %v436_v61 }
 0x1ee   : > { %v359_v45 = vpop.xlane.xlu2 %358 }
 0x1ef   : > { %v360_v46 = vadd.f32 %v359_v45, %v356_v44 }
 0x1f1   : > { %362 = vst.msk [vmem:[#allocation3] sm:$0xff] %vm298_vm3, %v360_v46 }
 0x1f6   : > { %v367_v48 = vpop.permute.xlu2 %366 }
 0x1f7   : > { %v369_v49 = vmul.f32 %v367_v48, %v363_v47 }
 0x1f8   : > { %v478_v59 = vld [vmem:[#allocation3] sm:$0xff] }
 0x1f9   : > { %v387_v50 = vpop.f32.mrf.mxu1 }
 0x1fa   : > { %v391_v51 = vadd.f32 %v387_v50, %v369_v49 }
 0x1fc   : > { %392 = vst.msk [vmem:[#allocation4] sm:$0xff] %vm316_vm0, %v391_v51  ;;  %v430_v52 = vpop.permute.xlu1 %429 }
 0x1fd   : > { %v432_v53 = vsub.f32 %v417_v22, %v430_v52 }
 0x1ff   : > { %v433_v54 = vmul.f32 1.442695, %v432_v53 }
 0x201   : > { %706 = vpow2.f32 %v433_v54  ;;  %v389_v55 = vpop.f32.mrf.mxu1 }
 0x202   : > { %708 = vrcp.f32 %v478_v59 }
 0x203   : > { %v443_v6 = vld [vmem:[#allocation4] sm:$0xff] }
 0x207   : > { %v707_v56 = vpop.eup %706  ;;  %v447_v5 = vpop.permute.xlu0 %446 }
 0x208   : > { %v438_v57 = vsel %vm339_vm2, %v707_v56, 0.0  ;;  %v450_v58 = vpack.c.bf16 %v707_v56, %v707_v56  ;;  %v709_v60 = vpop.eup %708  ;;  %v449_v7 = vmul.f32 %v447_v5, %v443_v6 }
 0x209   : > { %439 = vadd.xlane.f32.xlu1 %v438_v57 }
 0x20a   : > { %649 = vmatmul.msk.bf16.vlgmr.msra.gmra.mxu3 %vm339_vm2, %v450_v58 }
 0x222   : > { %483 = vperm.xlu1 %697, %v709_v60  }
 0x27c   : > { %v440_v63 = vpop.xlane.xlu1 %439 }
 0x27d   : > { %v441_v0 = vadd.f32 %v440_v63, %v437_v62 }
 0x27f   : > { %442 = vst.msk [vmem:[#allocation3 + $0x8] sm:$0xff] %vm298_vm3, %v441_v0 }
 0x286   : > { %v488_v1 = vld [vmem:[#allocation3 + $0x8] sm:$0xff] }
 0x287   : > { %710 = vrcp.f32 %v488_v1 }
 0x28d   : > { %v463_v2 = vpop.f32.mrf.mxu3  ;;  %v711_v3 = vpop.eup %710 }
 0x28e   : > { %468 = vrot.lane.b32.xlu2 %v463_v2, %s756_s5 }
 0x294   : > { %v484_v10 = vpop.permute.xlu1 %483 }
 0x295   : > { %v465_v4 = vpop.f32.mrf.mxu3 }
 0x296   : > { %493 = vperm.xlu2 %698, %v711_v3  }
 0x2e8   : > { %v469_v8 = vpop.permute.xlu2 %468 }
 0x2e9   : > { %v471_v9 = vadd.f32 %v469_v8, %v449_v7 }
 0x2eb   : > { %473 = vst.msk [vmem:[#allocation4] sm:$0xff] %vm472_vm6, %v471_v9 }
 0x2f0   : > { %v494_v13 = vpop.permute.xlu2 %493 }
 0x2f2   : > { %v480_v11 = vld [vmem:[#allocation4] sm:$0xff] }
 0x2f3   : > { %v486_v12 = vmul.f32 %v484_v10, %v480_v11 }
 0x2f5   : > { %487 = vst.msk [vmem:[#allocation4] sm:$0xff] %vm316_vm0, %v486_v12 }
 0x2fc   : > { %v490_v14 = vld [vmem:[#allocation4] sm:$0xff] }
 0x2fd   : > { %v496_v15 = vmul.f32 %v494_v13, %v490_v14 }
 0x2ff   : > { %497 = vst.msk [vmem:[#allocation4] sm:$0xff] %vm472_vm6, %v496_v15 }
 0x306   : > { %v498_v16 = vld [vmem:[#allocation4] sm:$0xff] }
 0x307   : > { %v499_v17 = vpack.c.bf16 %v498_v16, %v498_v16 }
 0x309   : > { %501 = vst.msk [vmem:[%s292_s8] sm:$0xf] %vm500_vm7, %v499_v17 }
 0x30a PF: > { %s13_s16 = sadd.s32 1, %s750_s16   ;;  %s865_s12 = smov %s742_s14 }
 0x30b   : > { %p10_p7 = scmp.ge.s32.totalorder %s13_s16, 6   ;;  %s866_s13 = smov %s746_s15 }
 0x30c   : > { %s867_s14 = smov %s870_s17  ;;  %s868_s15 = smov %s874_s18 }
 0x30d   :  { %12 = sbr.rel (!%p10_p7) target bundleno = 3 (0x3), region = 78 }

// kernel: _lambda_.15
= control target key start
LH: loop header
LB: loop body
LE: loop exit
PB: predicated region body
PF: predicated region fallthrough
CT: control target
= control target key end

     0   :  { %v599_v12 = vmov 128.0   ;;  %s854_s0 = inlined_call_operand.vmem [shape: bf16[16,128], index: 0, kind: input, shape index: {}]   ;;  %s855_s1 = inlined_call_operand.vmem [shape: f32[1,128], index: 1, kind: input, shape index: {}]   ;;  %s856_s2 = inlined_call_operand.vmem [shape: bf16[128,256], index: 2, kind: input, shape index: {}]   ;;  %s857_s3 = inlined_call_operand.vmem [shape: bf16[128,256], index: 3, kind: input, shape index: {}]   ;;  %s858_s4 = inlined_call_operand.vmem [shape: bf16[16,256], index: 4, kind: output, shape index: {}]  }
   0x1   :  { %v572_v0 = vld [vmem:[%s854_s0] sm:$0xff]   ;;  %v465_v5 = vld [vmem:[%s856_s2 + $0x70] sm:$0xf]  ;;  %v554_v6 = vld [vmem:[%s856_s2 + $0x74] sm:$0xf0]  ;;  %577 = vrcp.f32 %v599_v12 }
   0x2   :  { %v628_v1 = vunpack.c.l.bf16 %v572_v0  ;;  %v632_v3 = vunpack.c.h.bf16 %v572_v0  ;;  %v553_v7 = vld [vmem:[%s856_s2 + $0x74] sm:$0xf]  ;;  %v466_v8 = vor.u32 %v554_v6, %v465_v5  ;;  %v467_v9 = vld [vmem:[%s856_s2 + $0x78] sm:$0xf0]  ;;  %v529_v10 = vld [vmem:[%s857_s3 + $0x70] sm:$0xf] }
   0x3   :  { %v570_v11 = vld [vmem:[%s857_s3 + $0x74] sm:$0xf0]  ;;  %v470_v13 = vor.u32 %v553_v7, %v467_v9  ;;  %v569_v15 = vld [vmem:[%s857_s3 + $0x74] sm:$0xf]  ;;  %v531_v16 = vld [vmem:[%s857_s3 + $0x78] sm:$0xf0] }
   0x4   :  { %v21_v2 = vmul.f32 %v628_v1, %v628_v1  ;;  %v22_v4 = vmul.f32 %v632_v3, %v632_v3  ;;  %v530_v14 = vor.u32 %v570_v11, %v529_v10  ;;  %163 = vmatpush.bf16.msra.mxu0 %v466_v8  ;;  %v534_v17 = vor.u32 %v569_v15, %v531_v16  ;;  %v457_v18 = vld [vmem:[%s856_s2 + $0x60] sm:$0xf]  ;;  %v552_v19 = vld [vmem:[%s856_s2 + $0x64] sm:$0xf0]  ;;  %v551_v20 = vld [vmem:[%s856_s2 + $0x64] sm:$0xf] }
   0x5   :  { %177 = vmatpush.bf16.msra.mxu1 %v470_v13  ;;  %v458_v21 = vor.u32 %v552_v19, %v457_v18  ;;  %v459_v22 = vld [vmem:[%s856_s2 + $0x68] sm:$0xf0]  ;;  %v521_v23 = vld [vmem:[%s857_s3 + $0x60] sm:$0xf]  ;;  %v568_v24 = vld [vmem:[%s857_s3 + $0x64] sm:$0xf0] }
   0x6   :  { %23 = vadd.xlane.f32.xlu0 %v21_v2  ;;  %287 = vmatpush.bf16.msra.mxu2 %v530_v14  ;;  %v462_v25 = vor.u32 %v551_v20, %v459_v22  ;;  %v522_v26 = vor.u32 %v568_v24, %v521_v23  ;;  %v567_v27 = vld [vmem:[%s857_s3 + $0x64] sm:$0xf]  ;;  %v523_v28 = vld [vmem:[%s857_s3 + $0x68] sm:$0xf0]  ;;  %v449_v31 = vld [vmem:[%s856_s2 + $0x50] sm:$0xf] }
   0x7   :  { %301 = vmatpush.bf16.msra.mxu3 %v534_v17  ;;  %v526_v29 = vor.u32 %v567_v27, %v523_v28  ;;  %v684_v30 = vpop.eup %577  ;;  %v550_v32 = vld [vmem:[%s856_s2 + $0x54] sm:$0xf0]  ;;  %v549_v33 = vld [vmem:[%s856_s2 + $0x54] sm:$0xf]  ;;  %v451_v35 = vld [vmem:[%s856_s2 + $0x58] sm:$0xf0] }
   0x8   :  { %164 = vmatpush.bf16.msra.mxu0 %v458_v21  ;;  %v450_v34 = vor.u32 %v550_v32, %v449_v31  ;;  %v513_v36 = vld [vmem:[%s857_s3 + $0x50] sm:$0xf]  ;;  %v566_v37 = vld [vmem:[%s857_s3 + $0x54] sm:$0xf0]  ;;  %v454_v38 = vor.u32 %v549_v33, %v451_v35  ;;  %v565_v40 = vld [vmem:[%s857_s3 + $0x54] sm:$0xf]  ;;  %vm32_vm0 = vweird.f32 %v684_v30 }
   0x9   :  { %178 = vmatpush.bf16.msra.mxu1 %v462_v25  ;;  %v514_v39 = vor.u32 %v566_v37, %v513_v36  ;;  %v515_v41 = vld [vmem:[%s857_s3 + $0x58] sm:$0xf0]  ;;  %v28_v42 = vmul.f32 128.0, %v684_v30  ;;  %v441_v44 = vld [vmem:[%s856_s2 + $0x40] sm:$0xf] }
   0xa   :  { %288 = vmatpush.bf16.msra.mxu2 %v522_v26  ;;  %v518_v43 = vor.u32 %v565_v40, %v515_v41  ;;  %v548_v45 = vld [vmem:[%s856_s2 + $0x44] sm:$0xf0]  ;;  %v547_v46 = vld [vmem:[%s856_s2 + $0x44] sm:$0xf]  ;;  %v443_v48 = vld [vmem:[%s856_s2 + $0x48] sm:$0xf0] }
   0xb   :  { %302 = vmatpush.bf16.msra.mxu3 %v526_v29  ;;  %v442_v47 = vor.u32 %v548_v45, %v441_v44  ;;  %v505_v49 = vld [vmem:[%s857_s3 + $0x40] sm:$0xf]  ;;  %v564_v50 = vld [vmem:[%s857_s3 + $0x44] sm:$0xf0]  ;;  %v446_v51 = vor.u32 %v547_v46, %v443_v48  ;;  %v563_v53 = vld [vmem:[%s857_s3 + $0x44] sm:$0xf] }
   0xc   :  { %165 = vmatpush.bf16.msra.mxu0 %v450_v34  ;;  %v506_v52 = vor.u32 %v564_v50, %v505_v49  ;;  %v507_v54 = vld [vmem:[%s857_s3 + $0x48] sm:$0xf0]  ;;  %v29_v55 = vsub.f32 1.0, %v28_v42  ;;  %v433_v57 = vld [vmem:[%s856_s2 + $0x30] sm:$0xf] }
   0xd   :  { %179 = vmatpush.bf16.msra.mxu1 %v454_v38  ;;  %v510_v56 = vor.u32 %v563_v53, %v507_v54  ;;  %v546_v58 = vld [vmem:[%s856_s2 + $0x34] sm:$0xf0]  ;;  %v545_v59 = vld [vmem:[%s856_s2 + $0x34] sm:$0xf]  ;;  %v435_v61 = vld [vmem:[%s856_s2 + $0x38] sm:$0xf0] }
   0xe   :  { %25 = vadd.xlane.f32.xlu0 %v22_v4  ;;  %289 = vmatpush.bf16.msra.mxu2 %v514_v39  ;;  %v434_v60 = vor.u32 %v546_v58, %v433_v57  ;;  %v497_v62 = vld [vmem:[%s857_s3 + $0x30] sm:$0xf]  ;;  %v562_v63 = vld [vmem:[%s857_s3 + $0x34] sm:$0xf0]  ;;  %v438_v0 = vor.u32 %v545_v59, %v435_v61  ;;  %v561_v4 = vld [vmem:[%s857_s3 + $0x34] sm:$0xf]  ;;  %v30_v6 = vmul.f32 %v684_v30, %v29_v55 }
   0xf   :  { %303 = vmatpush.bf16.msra.mxu3 %v518_v43  ;;  %v498_v2 = vor.u32 %v562_v63, %v497_v62  ;;  %v499_v5 = vld [vmem:[%s857_s3 + $0x38] sm:$0xf0]  ;;  %v425_v8 = vld [vmem:[%s856_s2 + $0x20] sm:$0xf]  ;;  %v544_v9 = vld [vmem:[%s856_s2 + $0x24] sm:$0xf0] }
  0x10   :  { %166 = vmatpush.bf16.msra.mxu0 %v442_v47  ;;  %v502_v7 = vor.u32 %v561_v4, %v499_v5  ;;  %v543_v10 = vld [vmem:[%s856_s2 + $0x24] sm:$0xf]  ;;  %v426_v11 = vor.u32 %v544_v9, %v425_v8  ;;  %v427_v12 = vld [vmem:[%s856_s2 + $0x28] sm:$0xf0]  ;;  %v489_v13 = vld [vmem:[%s857_s3 + $0x20] sm:$0xf]  ;;  %v31_v19 = vadd.f32 %v684_v30, %v30_v6 }
  0x11   :  { %180 = vmatpush.bf16.msra.mxu1 %v446_v51  ;;  %v560_v14 = vld [vmem:[%s857_s3 + $0x24] sm:$0xf0]  ;;  %v430_v15 = vor.u32 %v543_v10, %v427_v12  ;;  %v559_v17 = vld [vmem:[%s857_s3 + $0x24] sm:$0xf]  ;;  %v491_v18 = vld [vmem:[%s857_s3 + $0x28] sm:$0xf0] }
  0x12   :  { %290 = vmatpush.bf16.msra.mxu2 %v506_v52  ;;  %v490_v16 = vor.u32 %v560_v14, %v489_v13  ;;  %v494_v20 = vor.u32 %v559_v17, %v491_v18  ;;  %v417_v21 = vld [vmem:[%s856_s2 + $0x10] sm:$0xf]  ;;  %v542_v22 = vld [vmem:[%s856_s2 + $0x14] sm:$0xf0]  ;;  %v541_v23 = vld [vmem:[%s856_s2 + $0x14] sm:$0xf]  ;;  %v33_v33 = vsel %vm32_vm0, %v684_v30, %v31_v19 }
  0x13   :  { %304 = vmatpush.bf16.msra.mxu3 %v510_v56  ;;  %v418_v24 = vor.u32 %v542_v22, %v417_v21  ;;  %v419_v25 = vld [vmem:[%s856_s2 + $0x18] sm:$0xf0]  ;;  %v481_v26 = vld [vmem:[%s857_s3 + $0x10] sm:$0xf]  ;;  %v558_v27 = vld [vmem:[%s857_s3 + $0x14] sm:$0xf0] }
  0x14   :  { %167 = vmatpush.bf16.msra.mxu0 %v434_v60  ;;  %v422_v28 = vor.u32 %v541_v23, %v419_v25  ;;  %v482_v29 = vor.u32 %v558_v27, %v481_v26  ;;  %v557_v31 = vld [vmem:[%s857_s3 + $0x14] sm:$0xf]  ;;  %v483_v32 = vld [vmem:[%s857_s3 + $0x18] sm:$0xf0]  ;;  %v409_v35 = vld [vmem:[%s856_s2] sm:$0xf] }
  0x15   :  { %181 = vmatpush.bf16.msra.mxu1 %v438_v0  ;;  %v486_v34 = vor.u32 %v557_v31, %v483_v32  ;;  %v540_v36 = vld [vmem:[%s856_s2 + $0x4] sm:$0xf0]  ;;  %v539_v37 = vld [vmem:[%s856_s2 + $0x4] sm:$0xf]  ;;  %v411_v30 = vld [vmem:[%s856_s2 + $0x8] sm:$0xf0] }
  0x16   :  { %291 = vmatpush.bf16.msra.mxu2 %v498_v2  ;;  %v410_v39 = vor.u32 %v540_v36, %v409_v35  ;;  %v473_v40 = vld [vmem:[%s857_s3] sm:$0xf]  ;;  %v556_v41 = vld [vmem:[%s857_s3 + $0x4] sm:$0xf0]  ;;  %v414_v43 = vor.u32 %v539_v37, %v411_v30  ;;  %v555_v45 = vld [vmem:[%s857_s3 + $0x4] sm:$0xf] }
  0x17   :  { %305 = vmatpush.bf16.msra.mxu3 %v502_v7  ;;  %v474_v44 = vor.u32 %v556_v41, %v473_v40  ;;  %v475_v46 = vld [vmem:[%s857_s3 + $0x8] sm:$0xf0]  ;;  %v576_v4 = vld [vmem:[%s855_s1] ss:$0 sm:$0xff] }
  0x18   :  { %168 = vmatpush.bf16.msra.mxu0 %v426_v11  ;;  %v478_v47 = vor.u32 %v555_v45, %v475_v46 }
  0x19   :  { %182 = vmatpush.bf16.msra.mxu1 %v430_v15 }
  0x1a   :  { %292 = vmatpush.bf16.msra.mxu2 %v490_v16 }
  0x1b   :  { %306 = vmatpush.bf16.msra.mxu3 %v494_v20 }
  0x1c   :  { %169 = vmatpush.bf16.msra.mxu0 %v418_v24 }
  0x1d   :  { %183 = vmatpush.bf16.msra.mxu1 %v422_v28 }
  0x1e   :  { %293 = vmatpush.bf16.msra.mxu2 %v482_v29 }
  0x1f   :  { %307 = vmatpush.bf16.msra.mxu3 %v486_v34 }
  0x20   :  { %170 = vmatpush.bf16.msra.mxu0 %v410_v39 }
  0x21   :  { %184 = vmatpush.bf16.msra.mxu1 %v414_v43 }
  0x22   :  { %294 = vmatpush.bf16.msra.mxu2 %v474_v44 }
  0x23   :  { %308 = vmatpush.bf16.msra.mxu3 %v478_v47 }
  0x79   :  { %v24_v38 = vpop.xlane.xlu0 %23 }
  0x7a   :  { %v34_v42 = vmul.f32 %v33_v33, %v24_v38 }
  0x7c   :  { %v36_v48 = vadd.f32 1e-05, %v34_v42 }
  0x7e   :  { %579 = vrsqrt.f32 %v36_v48  ;;  %vm44_vm2 = vweird.f32 %v36_v48 }
  0x81   :  { %v26_v49 = vpop.xlane.xlu0 %25 }
  0x82   :  { %v35_v50 = vmul.f32 %v33_v33, %v26_v49 }
  0x84   :  { %v580_v51 = vpop.eup %579  ;;  %v37_v52 = vadd.f32 1e-05, %v35_v50 }
  0x85   :  { %v39_v53 = vmul.f32 %v580_v51, %v36_v48  ;;  %vm45_vm1 = vweird.f32 %v580_v51 }
  0x86   :  { %581 = vrsqrt.f32 %v37_v52  ;;  %vm46_vm3 = vmor %vm44_vm2, %vm45_vm1  ;;  %vm54_vm5 = vweird.f32 %v37_v52 }
  0x87   :  { %v40_v54 = vmul.f32 %v580_v51, %v39_v53 }
  0x89   :  { %v41_v55 = vmul.f32 0.5, %v40_v54 }
  0x8b   :  { %v42_v56 = vsub.f32 1.5, %v41_v55 }
  0x8c   :  { %v582_v57 = vpop.eup %581 }
  0x8d   :  { %v49_v58 = vmul.f32 %v582_v57, %v37_v52  ;;  %v43_v59 = vmul.f32 %v580_v51, %v42_v56  ;;  %vm55_vm4 = vweird.f32 %v582_v57 }
  0x8e   :  { %vm56_vm6 = vmor %vm54_vm5, %vm55_vm4 }
  0x8f   :  { %v50_v60 = vmul.f32 %v582_v57, %v49_v58  ;;  %v47_v62 = vsel %vm46_vm3, %v580_v51, %v43_v59 }
  0x90   :  { %v58_v2 = vmul.f32 %v628_v1, %v47_v62 }
  0x91   :  { %v51_v61 = vmul.f32 0.5, %v50_v60 }
  0x92   :  { %v64_v7 = vmul.f32 %v576_v4, %v58_v2 }
  0x93   :  { %v52_v63 = vsub.f32 1.5, %v51_v61 }
  0x95   :  { %v53_v0 = vmul.f32 %v582_v57, %v52_v63 }
  0x97   :  { %v57_v5 = vsel %vm56_vm6, %v582_v57, %v53_v0 }
  0x98   :  { %v59_v6 = vmul.f32 %v632_v3, %v57_v5 }
  0x9a   :  { %v65_v8 = vmul.f32 %v576_v4, %v59_v6 }
  0x9c   :  { %v66_v9 = vpack.c.bf16 %v65_v8, %v64_v7 }
  0x9e   :  { %171 = vmatmul.bf16.vlgmr.msra.gmra.mxu0 %v66_v9  ;;  %185 = vmatmul.bf16.vlgmr.msra.gmra.mxu1 %v66_v9 }
  0x9f   :  { %295 = vmatmul.bf16.vlgmr.msra.gmra.mxu2 %v66_v9  ;;  %309 = vmatmul.bf16.vlgmr.msra.gmra.mxu3 %v66_v9 }
 0x11b   :  { %v172_v10 = vpop.f32.mrf.mxu0  ;;  %v186_v11 = vpop.f32.mrf.mxu1 }
 0x11c   :  { %v535_v12 = vmul.f32 -1.442695, %v172_v10  ;;  %v536_v13 = vmul.f32 -1.442695, %v186_v11 }
 0x11e   :  { %583 = vpow2.f32 %v535_v12 }
 0x11f   :  { %585 = vpow2.f32 %v536_v13 }
 0x122   :  { %v296_v48 = vpop.f32.mrf.mxu2  ;;  %v310_v54 = vpop.f32.mrf.mxu3 }
 0x123   :  { %v840_v1 = vpop.f32.mrf.mxu0  ;;  %v842_v14 = vpop.f32.mrf.mxu1 }
 0x124   :  { %v584_v15 = vpop.eup %583  ;;  %v537_v3 = vmul.f32 -1.442695, %v840_v1  ;;  %v538_v18 = vmul.f32 -1.442695, %v842_v14 }
 0x125   :  { %v586_v16 = vpop.eup %585  ;;  %v327_v17 = vadd.f32 1.0, %v584_v15 }
 0x126   :  { %v328_v19 = vadd.f32 1.0, %v586_v16  ;;  %587 = vpow2.f32 %v537_v3 }
 0x127   :  { %589 = vrcp.f32 %v327_v17  ;;  %v340_v29 = vand.u32 2147483647, %v327_v17  ;;  %v342_v31 = vand.u32 2147483648, %v327_v17  ;;  %vm336_vm9 = vweird.f32 %v327_v17 }
 0x128   :  { %591 = vrcp.f32 %v328_v19  ;;  %v357_v34 = vand.u32 2147483648, %v328_v19  ;;  %v355_v36 = vand.u32 2147483647, %v328_v19  ;;  %vm351_vm11 = vweird.f32 %v328_v19 }
 0x129   :  { %593 = vpow2.f32 %v538_v18  ;;  %v343_v39 = vor.u32 1.1754944e-38, %v342_v31  ;;  %vm341_vm12 = vcmp.eq.f32.partialorder %v340_v29, 8.507059e+37 }
 0x12a   :  { %v358_v41 = vor.u32 1.1754944e-38, %v357_v34  ;;  %vm356_vm14 = vcmp.eq.f32.partialorder %v355_v36, 8.507059e+37  ;;  %v312_v13 = vpop.f32.mrf.mxu3 }
 0x12c   :  { %v588_v20 = vpop.eup %587 }
 0x12d   :  { %v590_v21 = vpop.eup %589  ;;  %v329_v22 = vadd.f32 1.0, %v588_v20 }
 0x12e   :  { %v592_v23 = vpop.eup %591  ;;  %v332_v24 = vmul.f32 %v590_v21, %v327_v17  ;;  %vm337_vm7 = vweird.f32 %v590_v21 }
 0x12f   :  { %v594_v25 = vpop.eup %593  ;;  %v347_v26 = vmul.f32 %v592_v23, %v328_v19  ;;  %595 = vrcp.f32 %v329_v22  ;;  %vm352_vm8 = vweird.f32 %v592_v23  ;;  %vm338_vm10 = vmor %vm336_vm9, %vm337_vm7  ;;  %v372_v50 = vand.u32 2147483648, %v329_v22 }
 0x130   :  { %v333_v27 = vsub.f32 1.0, %v332_v24  ;;  %v330_v28 = vadd.f32 1.0, %v594_v25  ;;  %vm353_vm13 = vmor %vm351_vm11, %vm352_vm8  ;;  %v370_v56 = vand.u32 2147483647, %v329_v22  ;;  %vm366_vm0 = vweird.f32 %v329_v22 }
 0x131   :  { %v348_v32 = vsub.f32 1.0, %v347_v26  ;;  %v373_v60 = vor.u32 1.1754944e-38, %v372_v50 }
 0x132   :  { %v334_v33 = vmul.f32 %v590_v21, %v333_v27  ;;  %597 = vrcp.f32 %v330_v28  ;;  %v387_v61 = vand.u32 2147483648, %v330_v28  ;;  %v385_v0 = vand.u32 2147483647, %v330_v28 }
 0x133   :  { %v349_v35 = vmul.f32 %v592_v23, %v348_v32  ;;  %vm371_vm3 = vcmp.eq.f32.partialorder %v370_v56, 8.507059e+37  ;;  %vm381_vm4 = vweird.f32 %v330_v28 }
 0x134   :  { %v335_v37 = vadd.f32 %v590_v21, %v334_v33  ;;  %v388_v7 = vor.u32 1.1754944e-38, %v387_v61  ;;  %vm386_vm6 = vcmp.eq.f32.partialorder %v385_v0, 8.507059e+37 }
 0x135   :  { %v596_v38 = vpop.eup %595  ;;  %v350_v30 = vadd.f32 %v592_v23, %v349_v35 }
 0x136   :  { %v339_v40 = vsel %vm338_vm10, %v590_v21, %v335_v37  ;;  %v362_v42 = vmul.f32 %v596_v38, %v329_v22  ;;  %vm367_vm15 = vweird.f32 %v596_v38 }
 0x137   :  { %v344_v43 = vsel %vm341_vm12, %v343_v39, %v339_v40  ;;  %v354_v44 = vsel %vm353_vm13, %v592_v23, %v350_v30  ;;  %vm368_vm1 = vmor %vm366_vm0, %vm367_vm15 }
 0x138   :  { %v598_v45 = vpop.eup %597  ;;  %v391_v46 = vmul.f32 %v344_v43, %v172_v10  ;;  %v359_v47 = vsel %vm356_vm14, %v358_v41, %v354_v44  ;;  %v363_v49 = vsub.f32 1.0, %v362_v42  ;;  %v298_v10 = vpop.f32.mrf.mxu2 }
 0x139   :  { %v392_v51 = vmul.f32 %v359_v47, %v186_v11  ;;  %v377_v52 = vmul.f32 %v598_v45, %v330_v28  ;;  %vm382_vm2 = vweird.f32 %v598_v45 }
 0x13a   :  { %v395_v53 = vmul.f32 %v391_v46, %v296_v48  ;;  %v364_v55 = vmul.f32 %v596_v38, %v363_v49  ;;  %vm383_vm5 = vmor %vm381_vm4, %vm382_vm2 }
 0x13b   :  { %v396_v57 = vmul.f32 %v392_v51, %v310_v54  ;;  %v378_v58 = vsub.f32 1.0, %v377_v52 }
 0x13c   :  { %v365_v59 = vadd.f32 %v596_v38, %v364_v55 }
 0x13d   :  { %v399_v62 = vpack.c.bf16 %v396_v57, %v395_v53  ;;  %v379_v63 = vmul.f32 %v598_v45, %v378_v58 }
 0x13e   :  { %v369_v2 = vsel %vm368_vm1, %v596_v38, %v365_v59 }
 0x13f   :  { %401 = vst [vmem:[%s858_s4] sm:$0xff] %v399_v62  ;;  %v374_v4 = vsel %vm371_vm3, %v373_v60, %v369_v2  ;;  %v380_v5 = vadd.f32 %v598_v45, %v379_v63 }
 0x140   :  { %v393_v6 = vmul.f32 %v374_v4, %v840_v1 }
 0x141   :  { %v384_v8 = vsel %vm383_vm5, %v598_v45, %v380_v5 }
 0x142   :  { %v389_v9 = vsel %vm386_vm6, %v388_v7, %v384_v8  ;;  %v397_v12 = vmul.f32 %v393_v6, %v298_v10 }
 0x143   :  { %v394_v11 = vmul.f32 %v389_v9, %v842_v14 }
 0x145   :  { %v398_v15 = vmul.f32 %v394_v11, %v312_v13 }
 0x147   :  { %v400_v3 = vpack.c.bf16 %v398_v15, %v397_v12 }
 0x149   :  { %402 = vst [vmem:[%s858_s4 + $0x8] sm:$0xff] %v400_v3 }

// kernel: _lambda_.16
= control target key start
LH: loop header
LB: loop body
LE: loop exit
PB: predicated region body
PF: predicated region fallthrough
CT: control target
= control target key end

     0   :  { %s398_s1 = inlined_call_operand.vmem [shape: bf16[256,128], index: 1, kind: input, shape index: {}]   ;;  %s399_s0 = inlined_call_operand.vmem [shape: bf16[16,256], index: 0, kind: input, shape index: {}]   ;;  %s400_s2 = inlined_call_operand.vmem [shape: bf16[16,128], index: 2, kind: input, shape index: {}]   ;;  %s401_s3 = inlined_call_operand.vmem [shape: bf16[16,128], index: 3, kind: output, shape index: {}]  }
   0x1   :  { %v294_v0 = vld [vmem:[%s398_s1 + $0x38] sm:$0xff]  ;;  %v293_v2 = vld [vmem:[%s398_s1 + $0x30] sm:$0xff]  ;;  %v292_v4 = vld [vmem:[%s398_s1 + $0x28] sm:$0xff] }
   0x2   :  { %v302_v1 = vld [vmem:[%s398_s1 + $0x78] sm:$0xff]  ;;  %162 = vmatpush.bf16.msra.mxu0 %v294_v0  ;;  %v301_v3 = vld [vmem:[%s398_s1 + $0x70] sm:$0xff]  ;;  %v300_v5 = vld [vmem:[%s398_s1 + $0x68] sm:$0xff] }
   0x3   :  { %176 = vmatpush.bf16.msra.mxu1 %v302_v1  ;;  %v291_v6 = vld [vmem:[%s398_s1 + $0x20] sm:$0xff]  ;;  %v290_v8 = vld [vmem:[%s398_s1 + $0x18] sm:$0xff]  ;;  %v289_v10 = vld [vmem:[%s398_s1 + $0x10] sm:$0xff] }
   0x4   :  { %v299_v7 = vld [vmem:[%s398_s1 + $0x60] sm:$0xff]  ;;  %v298_v9 = vld [vmem:[%s398_s1 + $0x58] sm:$0xff]  ;;  %v297_v11 = vld [vmem:[%s398_s1 + $0x50] sm:$0xff] }
   0x5   :  { %v288_v12 = vld [vmem:[%s398_s1 + $0x8] sm:$0xff]  ;;  %v287_v14 = vld [vmem:[%s398_s1] sm:$0xff] }
   0x6   :  { %163 = vmatpush.bf16.msra.mxu0 %v293_v2  ;;  %v296_v13 = vld [vmem:[%s398_s1 + $0x48] sm:$0xff]  ;;  %v295_v15 = vld [vmem:[%s398_s1 + $0x40] sm:$0xff] }
   0x7   :  { %177 = vmatpush.bf16.msra.mxu1 %v301_v3  ;;  %v215_v16 = vld [vmem:[%s399_s0] sm:$0xf]  ;;  %v286_v17 = vld [vmem:[%s399_s0 + $0x4] sm:$0xf0]  ;;  %v285_v18 = vld [vmem:[%s399_s0 + $0x4] sm:$0xf] }
   0x8   :  { %v217_v19 = vld [vmem:[%s399_s0 + $0x8] sm:$0xf0]  ;;  %v216_v20 = vor.u32 %v286_v17, %v215_v16  ;;  %v304_v24 = vld [vmem:[%s400_s2] sm:$0xff]  }
   0x9   :  { %v220_v21 = vor.u32 %v285_v18, %v217_v19  ;;  %v305_v26 = vunpack.c.l.bf16 %v304_v24  ;;  %v306_v27 = vunpack.c.h.bf16 %v304_v24 }
   0xa   :  { %164 = vmatpush.bf16.msra.mxu0 %v292_v4 }
   0xb   :  { %178 = vmatpush.bf16.msra.mxu1 %v300_v5 }
   0xe   :  { %165 = vmatpush.bf16.msra.mxu0 %v291_v6 }
   0xf   :  { %179 = vmatpush.bf16.msra.mxu1 %v299_v7 }
  0x12   :  { %166 = vmatpush.bf16.msra.mxu0 %v290_v8 }
  0x13   :  { %180 = vmatpush.bf16.msra.mxu1 %v298_v9 }
  0x16   :  { %167 = vmatpush.bf16.msra.mxu0 %v289_v10 }
  0x17   :  { %181 = vmatpush.bf16.msra.mxu1 %v297_v11 }
  0x1a   :  { %168 = vmatpush.bf16.msra.mxu0 %v288_v12 }
  0x1b   :  { %182 = vmatpush.bf16.msra.mxu1 %v296_v13 }
  0x1e   :  { %169 = vmatpush.bf16.msra.mxu0 %v287_v14 }
  0x1f   :  { %183 = vmatpush.bf16.msra.mxu1 %v295_v15 }
  0x21   :  { %170 = vmatmul.bf16.vlgmr.msra.gmra.mxu0 %v216_v20 }
  0x22   :  { %184 = vmatmul.bf16.vlgmr.msra.gmra.mxu1 %v220_v21 }
  0x9e   :  { %v171_v22 = vpop.f32.mrf.mxu0 }
  0x9f   :  { %v185_v23 = vpop.f32.mrf.mxu1 }
  0xa0   :  { %v186_v25 = vadd.f32 %v185_v23, %v171_v22 }
  0xa2   :  { %v203_v31 = vadd.f32 %v305_v26, %v186_v25 }
  0xa6   :  { %v173_v28 = vpop.f32.mrf.mxu0 }
  0xa7   :  { %v187_v29 = vpop.f32.mrf.mxu1 }
  0xa8   :  { %v188_v30 = vadd.f32 %v187_v29, %v173_v28 }
  0xaa   :  { %v204_v32 = vadd.f32 %v306_v27, %v188_v30 }
  0xac   :  { %v310_v33 = vpack.c.bf16 %v204_v32, %v203_v31 }
  0xae   :  { %311 = vst [vmem:[%s401_s3] sm:$0xff] %v310_v33  }

// kernel: _lambda_.23
= control target key start
LH: loop header
LB: loop body
LE: loop exit
PB: predicated region body
PF: predicated region fallthrough
CT: control target
= control target key end

     0   :  { %s659_s9 = smov 0   ;;  %s661_s10 = smov 0   ;;  %s799_s0 = inlined_call_operand.vmem [shape: bf16[16,256], index: 0, kind: input, shape index: {}]   ;;  %s800_s1 = inlined_call_operand.vmem [shape: s32[16,1], index: 1, kind: input, shape index: {}]   ;;  %s801_s2 = inlined_call_operand.vmem [shape: f32[8,128], index: 2, kind: output, shape index: {}]  }
   0x1   :  { %s663_s11 = smov 0   ;;  %s665_s12 = smov 0  }
   0x2   :  { %s667_s13 = smov 0  }
   0x3 LB: > { %s21_s14 = sadd.s32 1, %s631_s12  ;;  %p40_p1 = scmp.ne.s32.totalorder %s623_s10, %s619_s9  ;;  %s635_s13 = sphi %s667_s13, %s12_s13   ;;  %s631_s12 = sphi %s665_s12, %s805_s12   ;;  %s627_s11 = sphi %s663_s11, %s804_s11   ;;  %s623_s10 = sphi %s661_s10, %s803_s10   ;;  %s619_s9 = sphi %s659_s9, %s802_s9  }
   0x4   : > { %p22_p0 = scmp.ge.s32.totalorder %s21_s14, 2  ;;  %p41_p2 = scmp.eq.s32.totalorder %s635_s13, 0 }
   0x5   : > { %s33_s16 = sadd.s32 1, %s623_s10  ;;  %p508_p5 = scmp.ge.s32.totalorder %s635_s13, 2 }
   0x6   : > { %s807_s14 = smov (%p22_p0, %s21_s14), 0  ;;  %p42_p3 = por %p41_p2, %p40_p1 }
   0x7   : > { %s29_s15 = ssub.s32 %s631_s12, %s807_s14  ;;  %122 = sbr.rel (%p508_p5) target bundleno = 18 (0x12), region = 20 }
   0x8   : > { %p31_p4 = scmp.eq.s32.totalorder %s29_s15, 0 }
   0xa   : > { %s694_s17 = scalar_select %p31_p4, %s623_s10, %s33_s16  }
   0xc   : > { %125 = sbr.rel (!%p42_p3) target bundleno = 18 (0x12), region = 24  ;;  %s127_s18 = sand.u32 (%p42_p3), 1, %s623_s10  }
   0xd   : > { %s510_s19 = sshll.u32 (%p42_p3), %s631_s12, 2  ;;  %s509_s20 = sshll.u32 (%p42_p3), %s127_s18, 3 }
   0xe   : > { %s134_s23 = scalar_lea.vmem (%p42_p3), %s799_s0, %s510_s19  ;;  %s129_s24 = scalar_lea.vmem (%p42_p3), [#allocation6], %s509_s20 }
   0xf   : > { %v151_v0 = vld [vmem:[%s134_s23] sm:$0xf] (%p42_p3)  ;;  %v153_v1 = vld [vmem:[%s134_s23 + $0x8] sm:$0xf] (%p42_p3) }
  0x10   : > { %152 = vst [vmem:[%s129_s24] sm:$0xf] (%p42_p3), %v151_v0 }
  0x11   : > { %154 = vst [vmem:[%s129_s24 + $0x4] sm:$0xf] %v153_v1 }
  0x12 PF: > { %p511_p6 = scmp.ge.s32.totalorder %s635_s13, 1  ;;  %p181_p7 = scmp.lt.s32.totalorder %s635_s13, 3 }
  0x14   : > { %p182_p8 = pnand %p511_p6, %p181_p7 }
  0x15   : > { %s188_s25 = sand.u32 (!%p182_p8), 1, %s619_s9   ;;  %p217_p9 = scmp.eq.s32.totalorder (!%p182_p8), %s627_s11, 0 }
  0x16   : > { %185 = sbr.rel (%p182_p8) target bundleno = 656 (0x290), region = 65  ;;  %s512_s26 = sshll.u32 (!%p182_p8), %s188_s25, 3 }
  0x17   : > { %s190_s27 = scalar_lea.vmem (!%p182_p8), [#allocation6], %s512_s26 }
  0x1b   : > { %221 = sbr.rel (!%p217_p9) target bundleno = 32 (0x20), region = 73  ;;  %v637_v2 = vmov (%p217_p9), 0.0  }
  0x1c   : > { %222 = vst [vmem:[%s801_s2] sm:$0xff] (%p217_p9), %v637_v2 }
  0x20 PF: > { %p514_p10 = scmp.ne.s32.totalorder %s627_s11, 0 }
  0x22   : > { %225 = sbr.rel (%p514_p10) target bundleno = 48 (0x30), region = 77 }
  0x27   : > { %vm226_vm0 = vcmask 7168   ;;  %v638_v3 = vmov -1e+30   ;;  %v639_v4 = vmov 0.0   ;;  %v640_v5 = vmov 256.0  }
  0x28   : > { %227 = vst.msk [vmem:[#allocation2] sm:$0xff] %vm226_vm0, %v638_v3 }
  0x29   : > { %228 = vst.msk [vmem:[#allocation2 + $0x8] sm:$0xff] %vm226_vm0, %v638_v3 }
  0x2a   : > { %229 = vst.msk [vmem:[#allocation3] sm:$0xff] %vm226_vm0, %v639_v4 }
  0x2b   : > { %230 = vst.msk [vmem:[#allocation3 + $0x8] sm:$0xff] %vm226_vm0, %v639_v4 }
  0x2c   : > { %231 = vst.msk [vmem:[#allocation4] sm:$0xff] %vm226_vm0, %v639_v4 }
  0x2d   : > { %232 = vst.msk [vmem:[#allocation4 + $0x8] sm:$0xff] %vm226_vm0, %v639_v4 }
  0x2e   : > { %233 = vst.msk [vmem:[#allocation5] sm:$0xff] %vm226_vm0, %v640_v5 }
  0x2f   : > { %234 = vst.msk [vmem:[#allocation5 + $0x8] sm:$0xff] %vm226_vm0, %v640_v5 }
  0x30 PF: > { %v527_v6 = vld [vmem:[%s190_s27] sm:$0xff]   ;;  %v641_v9 = vmov 0   ;;  %v241_v11 = vlaneseq  ;;  %s515_s4 = sshll.u32 %s627_s11, 7  ;;  %vm286_vm1 = vcmask 7168   ;;  %v642_v37 = vmov 0.0   ;;  %p518_p11 = scmp.ne.s32.totalorder %s627_s11, 1 }
  0x31   : > { %v528_v7 = vunpack.c.l.bf16 %v527_v6  ;;  %v710_v8 = vunpack.c.h.bf16 %v527_v6  ;;  %583 = vset.pattern.permute.xlu1 %v641_v9  ;;  %584 = vset.pattern.permute.xlu0 %v641_v9  ;;  %v716_v10 = vld [vmem:[%s800_s1] sm:$0xff]  ;;  %v244_v13 = vstv %s515_s4  ;;  %v732_v22 = vld [vmem:[#allocation2 + $0x8] sm:$0xff]  ;;  %v254_v9 = vld [vmem:[#allocation3] sm:$0xff] }
  0x32   : > { %v242_v12 = vand.u32 127, %v241_v11  ;;  %v721_v14 = vld [vmem:[#allocation2] sm:$0xff]  ;;  %v750_v29 = vld [vmem:[%s800_s1 + $0x8] sm:$0xff] }
  0x33   : > { %246 = vmax.xlane.f32.xlu0 %v528_v7  ;;  %v301_v62 = vld [vmem:[#allocation4] sm:$0xff] }
  0x34   : > { %v245_v15 = vadd.s32 %v244_v13, %v242_v12 }
  0x35   : > { %v349_v59 = vld [vmem:[#allocation5] sm:$0xff] }
  0x3b   : > { %248 = vmax.xlane.f32.xlu0 %v710_v8 }
  0x4f   : > { %290 = vperm.xlu0 %584, %v716_v10  }
  0xa6   : > { %v723_v16 = vpop.xlane.xlu0 %246 }
  0xa7   : > { %v252_v17 = vmax.f32 %v721_v14, %v723_v16  ;;  %vm313_vm2 = vcmp.eq.f32.partialorder %v528_v7, %v723_v16  ;;  %vm347_vm3 = vcmp.gt.f32.partialorder %v723_v16, %v721_v14 }
  0xa8   : > { %v315_v18 = vsel %vm313_vm2, %v245_v15, 256 }
  0xa9   : > { %v256_v19 = vsub.f32 %v721_v14, %v252_v17  ;;  %355 = vst.msk [vmem:[#allocation2] sm:$0xff] %vm286_vm1, %v252_v17  ;;  %266 = vperm.xlu1 %583, %v252_v17   ;;  %v318_v20 = vshra.s32 %v315_v18, 16  ;;  %v317_v30 = vand.u32 65535, %v315_v18  ;;  %v255_v18 = vld [vmem:[#allocation3 + $0x8] sm:$0xff] }
  0xab   : > { %v320_v21 = vcvt.s32.f32 %v318_v20  ;;  %v319_v33 = vcvt.s32.f32 %v317_v30  ;;  %v258_v57 = vmul.f32 1.442695, %v256_v19 }
  0xad   : > { %321 = vmin.xlane.f32.xlu2 %v320_v21 }
  0xae   : > { %v734_v23 = vpop.xlane.xlu0 %248 }
  0xaf   : > { %v738_v24 = vmax.f32 %v732_v22, %v734_v23  ;;  %vm314_vm4 = vcmp.eq.f32.partialorder %v710_v8, %v734_v23  ;;  %vm348_vm9 = vcmp.gt.f32.partialorder %v734_v23, %v732_v22 }
  0xb0   : > { %v316_v25 = vsel %vm314_vm4, %v245_v15, 256 }
  0xb1   : > { %v257_v26 = vsub.f32 %v732_v22, %v738_v24  ;;  %356 = vst.msk [vmem:[#allocation2 + $0x8] sm:$0xff] %vm286_vm1, %v738_v24  ;;  %271 = vperm.xlu1 %583, %v738_v24   ;;  %v332_v27 = vshra.s32 %v316_v25, 16  ;;  %v331_v39 = vand.u32 65535, %v316_v25  ;;  %v302_v24 = vld [vmem:[#allocation4 + $0x8] sm:$0xff] }
  0xb3   : > { %v334_v28 = vcvt.s32.f32 %v332_v27  ;;  %v333_v43 = vcvt.s32.f32 %v331_v39  ;;  %v260_v5 = vmul.f32 1.442695, %v257_v26 }
  0xb5   : > { %335 = vmin.xlane.f32.xlu2 %v334_v28 }
  0xb9   : > { %293 = vperm.xlu1 %583, %v750_v29  }
  0xc1   : > { %v291_v31 = vpop.permute.xlu0 %290 }
  0xc2   : > { %vm295_vm6 = vcmp.eq.s32.totalorder %v245_v15, %v291_v31 }
  0xc3   : > { %v516_v38 = vsel %vm295_vm6, 1.0, %v642_v37 }
  0xc4   : > { %v303_v40 = vmul.f32 %v528_v7, %v516_v38 }
 0x11b   : > { %v267_v34 = vpop.permute.xlu1 %266 }
 0x11c   : > { %v274_v36 = vsub.f32 %v528_v7, %v267_v34 }
 0x11e   : > { %v276_v41 = vmul.f32 1.442695, %v274_v36 }
 0x120   : > { %v322_v32 = vpop.xlane.xlu2 %321  ;;  %585 = vpow2.f32 %v276_v41 }
 0x121   : > { %vm323_vm5 = vcmp.eq.f32.partialorder %v320_v21, %v322_v32  ;;  %v328_v53 = vcvt.f32.s32 %v322_v32 }
 0x122   : > { %v324_v35 = vsel %vm323_vm5, %v319_v33, inf }
 0x123   : > { %325 = vmin.xlane.f32.xlu2 %v324_v35  ;;  %v272_v45 = vpop.permute.xlu1 %271  ;;  %v329_v55 = vshll.u32 %v328_v53, 16 }
 0x124   : > { %v275_v46 = vsub.f32 %v710_v8, %v272_v45 }
 0x126   : > { %v278_v47 = vmul.f32 1.442695, %v275_v46  ;;  %v586_v48 = vpop.eup %585 }
 0x128   : > { %v336_v42 = vpop.xlane.xlu2 %335  ;;  %587 = vpow2.f32 %v278_v47 }
 0x129   : > { %vm337_vm7 = vcmp.eq.f32.partialorder %v334_v28, %v336_v42  ;;  %v342_v60 = vcvt.f32.s32 %v336_v42  ;;  %589 = vpow2.f32 %v258_v57 }
 0x12a   : > { %v338_v44 = vsel %vm337_vm7, %v333_v43, inf  ;;  %591 = vpow2.f32 %v260_v5 }
 0x12b   : > { %339 = vmin.xlane.f32.xlu1 %v338_v44  ;;  %305 = vadd.xlane.f32.xlu2 %v303_v40  ;;  %v294_v49 = vpop.permute.xlu1 %293  ;;  %v343_v2 = vshll.u32 %v342_v60, 16 }
 0x12c   : > { %vm296_vm8 = vcmp.eq.s32.totalorder %v245_v15, %v294_v49 }
 0x12d   : > { %v517_v51 = vsel %vm296_vm8, 1.0, %v642_v37 }
 0x12e   : > { %v588_v50 = vpop.eup %587  ;;  %v304_v52 = vmul.f32 %v710_v8, %v517_v51  ;;  %v350_v8 = vld [vmem:[#allocation5 + $0x8] sm:$0xff] }
 0x12f   : > { %v590_v7 = vpop.eup %589 }
 0x130   : > { %v262_v14 = vmul.f32 %v590_v7, %v254_v9  ;;  %v592_v17 = vpop.eup %591 }
 0x131   : > { %v263_v19 = vmul.f32 %v592_v17, %v255_v18 }
 0x133   : > { %280 = vadd.xlane.f32.xlu2 %v586_v48 }
 0x13b   : > { %282 = vadd.xlane.f32.xlu2 %v588_v50 }
 0x143   : > { %307 = vadd.xlane.f32.xlu2 %v304_v52 }
 0x196   : > { %v326_v54 = vpop.xlane.xlu2 %325 }
 0x197   : > { %v327_v56 = vcvt.f32.s32 %v326_v54 }
 0x199   : > { %v330_v58 = vadd.s32 %v329_v55, %v327_v56 }
 0x19b   : > { %v345_v61 = vcvt.s32.f32 %v330_v58 }
 0x19d   : > { %v351_v63 = vsel %vm347_vm3, %v345_v61, %v349_v59 }
 0x19e   : > { %353 = vst.msk [vmem:[#allocation5] sm:$0xff] %vm286_vm1, %v351_v63  ;;  %v340_v0 = vpop.xlane.xlu1 %339  ;;  %v306_v1 = vpop.xlane.xlu2 %305 }
 0x19f   : > { %v341_v3 = vcvt.f32.s32 %v340_v0  ;;  %v309_v4 = vadd.f32 %v306_v1, %v301_v62 }
 0x1a1   : > { %v344_v6 = vadd.s32 %v343_v2, %v341_v3  ;;  %311 = vst.msk [vmem:[#allocation4] sm:$0xff] %vm286_vm1, %v309_v4 }
 0x1a3   : > { %v346_v12 = vcvt.s32.f32 %v344_v6 }
 0x1a5   : > { %v352_v13 = vsel %vm348_vm9, %v346_v12, %v350_v8 }
 0x1a6   : > { %354 = vst.msk [vmem:[#allocation5 + $0x8] sm:$0xff] %vm286_vm1, %v352_v13  ;;  %v281_v15 = vpop.xlane.xlu2 %280 }
 0x1a7   : > { %v284_v16 = vadd.f32 %v281_v15, %v262_v14 }
 0x1a9   : > { %287 = vst.msk [vmem:[#allocation3] sm:$0xff] %vm286_vm1, %v284_v16 }
 0x1ae   : > { %v283_v20 = vpop.xlane.xlu2 %282 }
 0x1af   : > { %v285_v21 = vadd.f32 %v283_v20, %v263_v19 }
 0x1b1   : > { %288 = vst.msk [vmem:[#allocation3 + $0x8] sm:$0xff] %vm286_vm1, %v285_v21 }
 0x1b5   : > { %360 = sbr.rel (%p518_p11) target bundleno = 656 (0x290), region = 81 }
 0x1b6   : > { %v308_v25 = vpop.xlane.xlu2 %307 }
 0x1b7   : > { %v310_v26 = vadd.f32 %v308_v25, %v302_v24 }
 0x1b9   : > { %312 = vst.msk [vmem:[#allocation4 + $0x8] sm:$0xff] %vm286_vm1, %v310_v26 }
 0x1ba   : > { %vm361_vm10 = vcmp.ge.s32.totalorder %v716_v10, 0  ;;  %vm362_vm11 = vcmp.ge.s32.totalorder %v750_v29, 0  ;;  %v369_v22 = vld [vmem:[#allocation3] sm:$0xff]  ;;  %v643_v23 = vmov 0.0   ;;  %v370_v30 = vld [vmem:[#allocation3 + $0x8] sm:$0xff]  ;;  %v367_v35 = vld [vmem:[#allocation2] sm:$0xff]  ;;  %v385_v36 = vcvt.s32.f32 %v716_v10 }
 0x1bb   : > { %v519_v27 = vsel %vm361_vm10, 1.0, %v643_v23  ;;  %v520_v28 = vsel %vm362_vm11, 1.0, %v643_v23  ;;  %593 = vlog2.f32 %v369_v22  ;;  %v386_v37 = vcvt.s32.f32 %v750_v29  ;;  %v368_v39 = vld [vmem:[#allocation2 + $0x8] sm:$0xff]  ;;  %v383_v41 = vld [vmem:[#allocation5] sm:$0xff]  ;;  %v384_v42 = vld [vmem:[#allocation5 + $0x8] sm:$0xff] }
 0x1bc   : > { %595 = vlog2.f32 %v370_v30  ;;  %v419_v31 = vsel %vm286_vm1, %v519_v27, 0.0  ;;  %v420_v32 = vsel %vm286_vm1, %v520_v28, 0.0  ;;  %v377_v44 = vld [vmem:[#allocation4] sm:$0xff]  ;;  %vm387_vm12 = vcmp.eq.f32.partialorder %v383_v41, %v385_v36 }
 0x1bd   : > { %v421_v33 = vadd.f32 %v420_v32, %v419_v31  ;;  %vm388_vm13 = vcmp.eq.f32.partialorder %v384_v42, %v386_v37  ;;  %v521_v51 = vsel %vm387_vm12, 1.0, %v643_v23  ;;  %v432_v19 = vshrl.u32 %v241_v11, 7  ;;  %v442_v25 = vld [vmem:[%s801_s2] sm:$0xff] }
 0x1be   : > { %v522_v52 = vsel %vm388_vm13, 1.0, %v643_v23  ;;  %v393_v54 = vmul.f32 %v521_v51, %v519_v27 }
 0x1bf   : > { %422 = vadd.xlane.f32.xlu1 %v421_v33  ;;  %v394_v55 = vmul.f32 %v522_v52, %v520_v28  ;;  %vm435_vm14 = vcmp.eq.s32.totalorder %v432_v19, 2  ;;  %vm434_vm15 = vcmp.eq.s32.totalorder %v432_v19, 1  ;;  %vm433_vm0 = vcmp.eq.s32.totalorder %v432_v19, 0 }
 0x1c0   : > { %v378_v46 = vld [vmem:[#allocation4 + $0x8] sm:$0xff]  ;;  %v407_v57 = vsel %vm286_vm1, %v393_v54, 0.0 }
 0x1c1   : > { %v594_v34 = vpop.eup %593  ;;  %v408_v58 = vsel %vm286_vm1, %v394_v55, 0.0 }
 0x1c2   : > { %v596_v38 = vpop.eup %595  ;;  %v372_v40 = vmul.f32 0.6931472, %v594_v34  ;;  %v409_v59 = vadd.f32 %v408_v58, %v407_v57 }
 0x1c3   : > { %v374_v43 = vmul.f32 0.6931472, %v596_v38 }
 0x1c4   : > { %v375_v45 = vadd.f32 %v372_v40, %v367_v35 }
 0x1c5   : > { %v376_v47 = vadd.f32 %v374_v43, %v368_v39 }
 0x1c6   : > { %v379_v48 = vsub.f32 %v375_v45, %v377_v44 }
 0x1c7   : > { %v380_v49 = vsub.f32 %v376_v47, %v378_v46 }
 0x1c8   : > { %v381_v50 = vmul.f32 %v519_v27, %v379_v48 }
 0x1c9   : > { %v382_v10 = vmul.f32 %v520_v28, %v380_v49 }
 0x1ca   : > { %v395_v29 = vsel %vm286_vm1, %v381_v50, 0.0 }
 0x1cb   : > { %v396_v53 = vsel %vm286_vm1, %v382_v10, 0.0 }
 0x1cc   : > { %v397_v56 = vadd.f32 %v396_v53, %v395_v29 }
 0x1ce   : > { %398 = vadd.xlane.f32.xlu0 %v397_v56 }
 0x1d6   : > { %410 = vadd.xlane.f32.xlu0 %v409_v59 }
 0x232   : > { %v423_v60 = vpop.xlane.xlu1 %422 }
 0x233   : > { %v424_v62 = vrot.slane %v423_v60, 4 }
 0x235   : > { %v425_v1 = vadd.f32 %v424_v62, %v423_v60 }
 0x237   : > { %v426_v4 = vrot.slane %v425_v1, 2 }
 0x239   : > { %v427_v12 = vadd.f32 %v426_v4, %v425_v1 }
 0x23b   : > { %v428_v15 = vrot.slane %v427_v12, 1 }
 0x23d   : > { %v429_v18 = vadd.f32 %v428_v15, %v427_v12 }
 0x241   : > { %v399_v61 = vpop.xlane.xlu0 %398 }
 0x242   : > { %v400_v63 = vrot.slane %v399_v61, 4 }
 0x244   : > { %v401_v0 = vadd.f32 %v400_v63, %v399_v61 }
 0x246   : > { %v402_v2 = vrot.slane %v401_v0, 2 }
 0x248   : > { %v403_v3 = vadd.f32 %v402_v2, %v401_v0 }
 0x249   : > { %v411_v5 = vpop.xlane.xlu0 %410 }
 0x24a   : > { %v412_v6 = vrot.slane %v411_v5, 4  ;;  %v404_v7 = vrot.slane %v403_v3, 1 }
 0x24c   : > { %v413_v8 = vadd.f32 %v412_v6, %v411_v5  ;;  %v405_v9 = vadd.f32 %v404_v7, %v403_v3 }
 0x24e   : > { %v414_v13 = vrot.slane %v413_v8, 2  ;;  %530 = vpush %v405_v9 }
 0x250   : > { %v415_v14 = vadd.f32 %v414_v13, %v413_v8 }
 0x252   : > { %v416_v16 = vrot.slane %v415_v14, 1 }
 0x254   : > { %v417_v17 = vadd.f32 %v416_v16, %v415_v14 }
 0x256   : > { %532 = vpush %v417_v17 }
 0x257   : > { %534 = vpush %v429_v18 }
 0x27f   : > { %s531_s7 = spop %530 }
 0x280   : > { %v440_v26 = vstv %s531_s7 }
 0x287   : > { %s533_s8 = spop %532 }
 0x288   : > { %v438_v20 = vstv %s533_s8  ;;  %s535_s9 = spop %534 }
 0x289   : > { %v436_v21 = vstv %s535_s9 }
 0x28a   : > { %v437_v24 = vsel %vm435_vm14, %v436_v21, 0.0 }
 0x28b   : > { %v439_v22 = vsel %vm434_vm15, %v438_v20, %v437_v24 }
 0x28c   : > { %v441_v23 = vsel %vm433_vm0, %v440_v26, %v439_v22 }
 0x28d   : > { %v443_v27 = vadd.f32 %v442_v25, %v441_v23 }
 0x28f   : > { %444 = vst [vmem:[%s801_s2] sm:$0xff] %v443_v27 }
 0x290 PF: > { %s12_s13 = sadd.s32 1, %s635_s13   ;;  %s802_s9 = smov %s623_s10 }
 0x291   : > { %p9_p12 = scmp.ge.s32.totalorder %s12_s13, 4   ;;  %s803_s10 = smov %s694_s17 }
 0x292   : > { %s804_s11 = smov %s631_s12  ;;  %s805_s12 = smov %s807_s14 }
 0x293   :  { %11 = sbr.rel (!%p9_p12) target bundleno = 3 (0x3), region = 115 }

</bundles_post_ra>
